<compile_context>
chip_gen: v6e
topology: v6e:2x2x1
jax: 0.10.0
libtpu: 0.0.40
codegen_flags: <defaults>
</compile_context>

<pallas_src>
import jax
import jax.numpy as jnp
from jax.experimental import pallas as pl
from jax.experimental.pallas import tpu as pltpu


def _round_up(x: int, m: int) -> int:
    return ((x + m - 1) // m) * m


def _vmem_capacity_bytes() -> int:
    """Physical per-core VMEM; conservative (v7x, 64 MiB) fallback if query fails."""
    try:
        return int(pltpu.get_tpu_info().vmem_capacity_bytes)
    except Exception:
        return 64 * 1024 * 1024


def _make_mlp_kernel(num_layers: int, fuse_weights: bool, compute_dtype):
    """Fused MLP kernel: all matmuls + bias + ReLU (+ optional weights mul).

    Kernel refs: (x, w0, b0, ..., w_{L-1}, b_{L-1}, [wmul], out).
    ReLU after every layer except the last (outermost_linear=True).
    Weights/biases arrive already in `compute_dtype` (pre-cast in the wrapper),
    so no per-step weight casts execute on the VPU.
    """

    def kernel(*refs):
        x_ref = refs[0]
        out_ref = refs[-1]
        if fuse_weights:
            wmul_ref = refs[-2]
            param_refs = refs[1:-2]
        else:
            param_refs = refs[1:-1]

        h = x_ref[...].astype(compute_dtype)
        for layer in range(num_layers):
            w = param_refs[2 * layer][...]        # compute_dtype (pre-cast)
            b = param_refs[2 * layer + 1][...]    # compute_dtype (pre-cast)
            # MXU matmul with f32 accumulation.
            acc = jnp.dot(h, w, preferred_element_type=jnp.float32)
            if layer < num_layers - 1:
                # Bias-add + ReLU in compute_dtype: single cast of the f32 MXU
                # result, bf16 VPU math on v6e/v7x (no-op cast for f32 compute).
                h = jnp.maximum(acc.astype(compute_dtype) + b, 0)
            else:
                # Last layer: keep the f32 accumulator for the output.
                y = acc + b.astype(jnp.float32)
                if fuse_weights:
                    y = y * wmul_ref[...].astype(jnp.float32)
                out_ref[...] = y.astype(out_ref.dtype)

    return kernel


def init_mlp_params(key, in_features, out_features, num_hidden_layers,
                    hidden_features, dtype=jnp.float32):
    """Params mirroring init_weights_normal + PyTorch-default bias init.

    Weights stored pre-transposed as (fan_in, fan_out) so the kernel computes
    h @ W + b (== PyTorch x @ W.T + b).
    """
    dims = ([in_features] + [hidden_features] * (num_hidden_layers + 1)
            + [out_features])
    params = []
    for fan_in, fan_out in zip(dims[:-1], dims[1:]):
        key, kw, kb = jax.random.split(key, 3)
        # kaiming_normal_(a=0, mode='fan_in', nonlinearity='relu'): std=sqrt(2/fan_in)
        w = jax.random.normal(kw, (fan_in, fan_out), dtype) * jnp.sqrt(
            2.0 / fan_in).astype(dtype)
        bound = 1.0 / jnp.sqrt(jnp.asarray(fan_in, dtype))
        b = jax.random.uniform(kb, (1, fan_out), dtype, -bound, bound)
        params.append((w, b))
    return params


def mlp_forward(coords, params, weights=None, *, tile_n=1024,
                compute_dtype=jnp.float32, vmem_limit_bytes=None,
                single_buffer_params=True):
    """Pallas forward of MLP.forward(coords, weights).

    compute_dtype=jnp.bfloat16 feeds the MXU/VPU in bf16 (f32 accumulation);
    use only on v6e/v7x — keep the default f32 path on v5e.  With bf16, the
    inter-layer activations are bf16, so error compounds with depth relative
    to an f32 reference (intentional).
    """
    n, in_f = coords.shape
    out_f = params[-1][0].shape[1]
    num_layers = len(params)
    fuse_weights = weights is not None
    io_itemsize = jnp.dtype(coords.dtype).itemsize
    comp_itemsize = jnp.dtype(compute_dtype).itemsize

    # --- batch tiling --------------------------------------------------------
    # Multiple of 16 for sub-32-bit compute (clean sublane packing), else 8.
    granule = 16 if comp_itemsize < 4 else 8
    tile_n = max(granule, _round_up(min(int(tile_n), n), granule))
    if pl.cdiv(n, tile_n) < 2 and n > granule:
        # Prefer >= 2 grid steps so the "parallel" axis load-balances across the
        # two TensorCores on v7x (harmless on single-TC v5e/v6e).
        tile_n = max(granule, _round_up(pl.cdiv(n, 2), granule))
    n_pad = _round_up(n, tile_n)
    grid = (n_pad // tile_n,)

    x = coords if n_pad == n else jnp.pad(coords, ((0, n_pad - n), (0, 0)))

    # --- params: pre-cast (bf16 in HBM when requested), natural shapes -------
    flat_params, param_shapes = [], []
    params_bytes = 0
    prev = in_f
    for w, b in params:
        d_in, d_out = w.shape
        assert d_in == prev, "layer dimensions must chain"
        flat_params.append(w.astype(compute_dtype))
        flat_params.append(jnp.reshape(b, (1, d_out)).astype(compute_dtype))
        param_shapes.extend([(d_in, d_out), (1, d_out)])
        params_bytes += (d_in * d_out + d_out) * comp_itemsize
        prev = d_out
    assert prev == out_f
    max_f = max([in_f, out_f] + [w.shape[1] for w, _ in params])

    extra_inputs = []
    if fuse_weights:
        wmul = weights if n_pad == n else jnp.pad(weights, ((0, n_pad - n), (0, 0)))
        extra_inputs.append(wmul)

    # --- VMEM budget ---------------------------------------------------------
    param_bufs = 1 if single_buffer_params else 2
    cap = int(0.75 * _vmem_capacity_bytes())   # headroom for Mosaic scratch
    if param_bufs * params_bytes > cap:
        # TODO(synk): for hidden_features roughly >= 1.5-2K (f32) on v7x
        # (>= 2.5-3K on v5e/v6e) full-layer weight residency no longer fits
        # VMEM; add a hidden-dim grid axis / inner pltpu.emit_pipeline with an
        # f32 accumulator instead of loading whole weight matrices.
        raise ValueError("MLP weights do not fit resident in VMEM; "
                         "hidden-dim tiling not implemented.")
    if vmem_limit_bytes is None:
        stream = 2 * tile_n * in_f * io_itemsize          # x (double-buffered)
        stream += 2 * tile_n * out_f * io_itemsize        # out
        if fuse_weights:
            stream += 2 * tile_n * out_f * io_itemsize    # fused weights
        act = 4 * tile_n * max_f * 4                      # working activations
        vmem_limit_bytes = min(cap, max(32 * 1024 * 1024,
                                        2 * (stream + param_bufs * params_bytes + act)))
    vmem_limit_bytes = int(vmem_limit_bytes)

    # --- specs ---------------------------------------------------------------
    def _build_specs(param_mode):
        in_specs = [pl.BlockSpec((tile_n, in_f), lambda i: (i, 0))]
        for shape in param_shapes:
            # Weight-stationary: constant block index -> fetched once, stays in
            # VMEM across all batch tiles.
            if param_mode is None:
                in_specs.append(pl.BlockSpec(shape, lambda i: (0, 0)))
            else:
                in_specs.append(pl.BlockSpec(shape, lambda i: (0, 0),
                                             pipeline_mode=param_mode))
        if fuse_weights:
            in_specs.append(pl.BlockSpec((tile_n, out_f), lambda i: (i, 0)))
        return in_specs

    def _call(param_mode):
        return pl.pallas_call(
            _make_mlp_kernel(num_layers, fuse_weights, compute_dtype),
            out_shape=jax.ShapeDtypeStruct((n_pad, out_f), coords.dtype),
            grid=grid,
            in_specs=_build_specs(param_mode),
            out_specs=pl.BlockSpec((tile_n, out_f), lambda i: (i, 0)),
            compiler_params=pltpu.CompilerParams(
                dimension_semantics=("parallel",),
                vmem_limit_bytes=vmem_limit_bytes),
        )(x, *flat_params, *extra_inputs)

    if single_buffer_params:
        try:
            # Resident params have a constant index_map -> multi-buffering buys
            # nothing; single-buffer to halve their VMEM footprint.
            out = _call(pl.Buffered(1))
        except Exception:
            # Eager-mode safety net for jax versions rejecting buffer_count=1.
            out = _call(None)
    else:
        out = _call(None)

    # Slice off batch padding (last dim is already the natural out_features).
    return out[:n, :]


def _reference_forward(coords, params, weights=None):
    h = coords
    for i, (w, b) in enumerate(params):
        h = h @ w + b.reshape(1, -1)
        if i < len(params) - 1:
            h = jnp.maximum(h, 0.0)
    if weights is not None:
        h = h * weights
    return h


if __name__ == "__main__":
    # Small shapes consistent with the module's forward; batch chosen so the
    # grid has 2 steps and a remainder tile (exercises padding + slicing and
    # the v7x two-core load-balance path).
    batch = 300
    in_features = 16
    hidden_features = 32
    out_features = 16
    num_hidden_layers = 2

    key = jax.random.PRNGKey(0)
    k_params, k_x, k_w = jax.random.split(key, 3)

    params = init_mlp_params(k_params, in_features, out_features,
                             num_hidden_layers, hidden_features)
    coords = jax.random.normal(k_x, (batch, in_features), jnp.float32)
    # Optional per-output weights (MLP.forward `weights` kwarg), fused in-kernel.
    weights = jax.random.normal(k_w, (batch, out_features), jnp.float32)

    out = jax.block_until_ready(mlp_forward(coords, params))
    out_w = jax.block_until_ready(mlp_forward(coords, params, weights=weights))

    ref = _reference_forward(coords, params)
    ref_w = _reference_forward(coords, params, weights=weights)
    assert out.shape == (batch, out_features)
    assert jnp.allclose(out, ref, atol=1e-4, rtol=1e-4)
    assert jnp.allclose(out_w, ref_w, atol=1e-4, rtol=1e-4)

    # bf16-fed MXU/VPU path with f32 accumulation (v6e/v7x-friendly variant).
    out_bf16 = jax.block_until_ready(
        mlp_forward(coords, params, weights=weights,
                    compute_dtype=jnp.bfloat16))
    assert jnp.allclose(out_bf16, ref_w, atol=2e-1, rtol=2e-1)

    print("KERNEL_OK")
</pallas_src>

<mosaic_0001>
module attributes {stable_mosaic.version = 11 : i64} {
  func.func @kernel(%arg0: i32, %arg1: memref<152x16xf32, #tpu.memory_space<vmem>>, %arg2: memref<16x32xf32, #tpu.memory_space<vmem>>, %arg3: memref<1x32xf32, #tpu.memory_space<vmem>>, %arg4: memref<32x32xf32, #tpu.memory_space<vmem>>, %arg5: memref<1x32xf32, #tpu.memory_space<vmem>>, %arg6: memref<32x32xf32, #tpu.memory_space<vmem>>, %arg7: memref<1x32xf32, #tpu.memory_space<vmem>>, %arg8: memref<32x16xf32, #tpu.memory_space<vmem>>, %arg9: memref<1x16xf32, #tpu.memory_space<vmem>>, %arg10: memref<152x16xf32, #tpu.memory_space<vmem>>) attributes {dimension_semantics = [#tpu.dimension_semantics<parallel>], iteration_bounds = array<i64: 2>, scalar_prefetch = 0 : i64, scratch_operands = 0 : i64, tpu.core_type = #tpu.core_type<tc>, window_params = [{transform_indices = @transform_0, window_bounds = array<i64: 152, 16>}, {pipeline_mode = #tpu.pipeline_mode<synchronous>, transform_indices = @transform_1, window_bounds = array<i64: 16, 32>}, {pipeline_mode = #tpu.pipeline_mode<synchronous>, transform_indices = @transform_2, window_bounds = array<i64: 1, 32>}, {pipeline_mode = #tpu.pipeline_mode<synchronous>, transform_indices = @transform_3, window_bounds = array<i64: 32, 32>}, {pipeline_mode = #tpu.pipeline_mode<synchronous>, transform_indices = @transform_4, window_bounds = array<i64: 1, 32>}, {pipeline_mode = #tpu.pipeline_mode<synchronous>, transform_indices = @transform_5, window_bounds = array<i64: 32, 32>}, {pipeline_mode = #tpu.pipeline_mode<synchronous>, transform_indices = @transform_6, window_bounds = array<i64: 1, 32>}, {pipeline_mode = #tpu.pipeline_mode<synchronous>, transform_indices = @transform_7, window_bounds = array<i64: 32, 16>}, {pipeline_mode = #tpu.pipeline_mode<synchronous>, transform_indices = @transform_8, window_bounds = array<i64: 1, 16>}, {transform_indices = @transform_9, window_bounds = array<i64: 152, 16>}]} {
    %c0 = arith.constant 0 : index
    %c0_0 = arith.constant 0 : index
    %0 = vector.load %arg1[%c0, %c0_0] : memref<152x16xf32, #tpu.memory_space<vmem>>, vector<152x16xf32>
    %c0_1 = arith.constant 0 : index
    %c0_2 = arith.constant 0 : index
    %1 = vector.load %arg2[%c0_1, %c0_2] : memref<16x32xf32, #tpu.memory_space<vmem>>, vector<16x32xf32>
    %c0_3 = arith.constant 0 : index
    %c0_4 = arith.constant 0 : index
    %2 = vector.load %arg3[%c0_3, %c0_4] : memref<1x32xf32, #tpu.memory_space<vmem>>, vector<1x32xf32>
    %cst = arith.constant dense<0.000000e+00> : vector<152x32xf32>
    %3 = tpu.matmul %0, %1, %cst {dimension_numbers = #tpu.dot_dimension_numbers<[1], [0], [0], [1], [0, 0, 1, 1], [], []>} : vector<152x16xf32>, vector<16x32xf32>, vector<152x32xf32> -> vector<152x32xf32>
    %4 = vector.broadcast %2 : vector<1x32xf32> to vector<152x32xf32>
    %5 = arith.addf %3, %4 : vector<152x32xf32>
    %cst_5 = arith.constant 0.000000e+00 : f32
    %6 = vector.broadcast %cst_5 : f32 to vector<152x32xf32>
    %7 = arith.maximumf %5, %6 : vector<152x32xf32>
    %c0_6 = arith.constant 0 : index
    %c0_7 = arith.constant 0 : index
    %8 = vector.load %arg4[%c0_6, %c0_7] : memref<32x32xf32, #tpu.memory_space<vmem>>, vector<32x32xf32>
    %c0_8 = arith.constant 0 : index
    %c0_9 = arith.constant 0 : index
    %9 = vector.load %arg5[%c0_8, %c0_9] : memref<1x32xf32, #tpu.memory_space<vmem>>, vector<1x32xf32>
    %cst_10 = arith.constant dense<0.000000e+00> : vector<152x32xf32>
    %10 = tpu.matmul %7, %8, %cst_10 {dimension_numbers = #tpu.dot_dimension_numbers<[1], [0], [0], [1], [0, 0, 1, 1], [], []>} : vector<152x32xf32>, vector<32x32xf32>, vector<152x32xf32> -> vector<152x32xf32>
    %11 = vector.broadcast %9 : vector<1x32xf32> to vector<152x32xf32>
    %12 = arith.addf %10, %11 : vector<152x32xf32>
    %cst_11 = arith.constant 0.000000e+00 : f32
    %13 = vector.broadcast %cst_11 : f32 to vector<152x32xf32>
    %14 = arith.maximumf %12, %13 : vector<152x32xf32>
    %c0_12 = arith.constant 0 : index
    %c0_13 = arith.constant 0 : index
    %15 = vector.load %arg6[%c0_12, %c0_13] : memref<32x32xf32, #tpu.memory_space<vmem>>, vector<32x32xf32>
    %c0_14 = arith.constant 0 : index
    %c0_15 = arith.constant 0 : index
    %16 = vector.load %arg7[%c0_14, %c0_15] : memref<1x32xf32, #tpu.memory_space<vmem>>, vector<1x32xf32>
    %cst_16 = arith.constant dense<0.000000e+00> : vector<152x32xf32>
    %17 = tpu.matmul %14, %15, %cst_16 {dimension_numbers = #tpu.dot_dimension_numbers<[1], [0], [0], [1], [0, 0, 1, 1], [], []>} : vector<152x32xf32>, vector<32x32xf32>, vector<152x32xf32> -> vector<152x32xf32>
    %18 = vector.broadcast %16 : vector<1x32xf32> to vector<152x32xf32>
    %19 = arith.addf %17, %18 : vector<152x32xf32>
    %cst_17 = arith.constant 0.000000e+00 : f32
    %20 = vector.broadcast %cst_17 : f32 to vector<152x32xf32>
    %21 = arith.maximumf %19, %20 : vector<152x32xf32>
    %c0_18 = arith.constant 0 : index
    %c0_19 = arith.constant 0 : index
    %22 = vector.load %arg8[%c0_18, %c0_19] : memref<32x16xf32, #tpu.memory_space<vmem>>, vector<32x16xf32>
    %c0_20 = arith.constant 0 : index
    %c0_21 = arith.constant 0 : index
    %23 = vector.load %arg9[%c0_20, %c0_21] : memref<1x16xf32, #tpu.memory_space<vmem>>, vector<1x16xf32>
    %cst_22 = arith.constant dense<0.000000e+00> : vector<152x16xf32>
    %24 = tpu.matmul %21, %22, %cst_22 {dimension_numbers = #tpu.dot_dimension_numbers<[1], [0], [0], [1], [0, 0, 1, 1], [], []>} : vector<152x32xf32>, vector<32x16xf32>, vector<152x16xf32> -> vector<152x16xf32>
    %25 = vector.broadcast %23 : vector<1x16xf32> to vector<152x16xf32>
    %26 = arith.addf %24, %25 : vector<152x16xf32>
    %c0_23 = arith.constant 0 : index
    %c0_24 = arith.constant 0 : index
    %27 = vector.load %arg10[%c0_23, %c0_24] : memref<152x16xf32, #tpu.memory_space<vmem>>, vector<152x16xf32>
    tpu.vector_store %arg10[%c0_23, %c0_24], %26 {strides = array<i32>} : memref<152x16xf32, #tpu.memory_space<vmem>>, vector<152x16xf32>,
    return
  }
  func.func @transform_0(%arg0: i32) -> (i32, i32) {
    %c0_i32 = arith.constant 0 : i32
    %c0_i32_0 = arith.constant 0 : i32
    return %arg0, %c0_i32 : i32, i32
  }
  func.func @transform_1(%arg0: i32) -> (i32, i32) {
    %c0_i32 = arith.constant 0 : i32
    %c0_i32_0 = arith.constant 0 : i32
    %c0_i32_1 = arith.constant 0 : i32
    return %c0_i32, %c0_i32_0 : i32, i32
  }
  func.func @transform_2(%arg0: i32) -> (i32, i32) {
    %c0_i32 = arith.constant 0 : i32
    %c0_i32_0 = arith.constant 0 : i32
    %c0_i32_1 = arith.constant 0 : i32
    return %c0_i32, %c0_i32_0 : i32, i32
  }
  func.func @transform_3(%arg0: i32) -> (i32, i32) {
    %c0_i32 = arith.constant 0 : i32
    %c0_i32_0 = arith.constant 0 : i32
    %c0_i32_1 = arith.constant 0 : i32
    return %c0_i32, %c0_i32_0 : i32, i32
  }
  func.func @transform_4(%arg0: i32) -> (i32, i32) {
    %c0_i32 = arith.constant 0 : i32
    %c0_i32_0 = arith.constant 0 : i32
    %c0_i32_1 = arith.constant 0 : i32
    return %c0_i32, %c0_i32_0 : i32, i32
  }
  func.func @transform_5(%arg0: i32) -> (i32, i32) {
    %c0_i32 = arith.constant 0 : i32
    %c0_i32_0 = arith.constant 0 : i32
    %c0_i32_1 = arith.constant 0 : i32
    return %c0_i32, %c0_i32_0 : i32, i32
  }
  func.func @transform_6(%arg0: i32) -> (i32, i32) {
    %c0_i32 = arith.constant 0 : i32
    %c0_i32_0 = arith.constant 0 : i32
    %c0_i32_1 = arith.constant 0 : i32
    return %c0_i32, %c0_i32_0 : i32, i32
  }
  func.func @transform_7(%arg0: i32) -> (i32, i32) {
    %c0_i32 = arith.constant 0 : i32
    %c0_i32_0 = arith.constant 0 : i32
    %c0_i32_1 = arith.constant 0 : i32
    return %c0_i32, %c0_i32_0 : i32, i32
  }
  func.func @transform_8(%arg0: i32) -> (i32, i32) {
    %c0_i32 = arith.constant 0 : i32
    %c0_i32_0 = arith.constant 0 : i32
    %c0_i32_1 = arith.constant 0 : i32
    return %c0_i32, %c0_i32_0 : i32, i32
  }
  func.func @transform_9(%arg0: i32) -> (i32, i32) {
    %c0_i32 = arith.constant 0 : i32
    %c0_i32_0 = arith.constant 0 : i32
    return %arg0, %c0_i32 : i32, i32
  }
}

module attributes {stable_mosaic.version = 11 : i64} {
  func.func @kernel(%arg0: i32, %arg1: memref<152x16xf32, #tpu.memory_space<vmem>>, %arg2: memref<16x32xf32, #tpu.memory_space<vmem>>, %arg3: memref<1x32xf32, #tpu.memory_space<vmem>>, %arg4: memref<32x32xf32, #tpu.memory_space<vmem>>, %arg5: memref<1x32xf32, #tpu.memory_space<vmem>>, %arg6: memref<32x32xf32, #tpu.memory_space<vmem>>, %arg7: memref<1x32xf32, #tpu.memory_space<vmem>>, %arg8: memref<32x16xf32, #tpu.memory_space<vmem>>, %arg9: memref<1x16xf32, #tpu.memory_space<vmem>>, %arg10: memref<152x16xf32, #tpu.memory_space<vmem>>) attributes {dimension_semantics = [#tpu.dimension_semantics<parallel>], iteration_bounds = array<i64: 2>, scalar_prefetch = 0 : i64, scratch_operands = 0 : i64, tpu.core_type = #tpu.core_type<tc>, window_params = [{transform_indices = @transform_0, window_bounds = array<i64: 152, 16>}, {pipeline_mode = #tpu.pipeline_mode<synchronous>, transform_indices = @transform_1, window_bounds = array<i64: 16, 32>}, {pipeline_mode = #tpu.pipeline_mode<synchronous>, transform_indices = @transform_2, window_bounds = array<i64: 1, 32>}, {pipeline_mode = #tpu.pipeline_mode<synchronous>, transform_indices = @transform_3, window_bounds = array<i64: 32, 32>}, {pipeline_mode = #tpu.pipeline_mode<synchronous>, transform_indices = @transform_4, window_bounds = array<i64: 1, 32>}, {pipeline_mode = #tpu.pipeline_mode<synchronous>, transform_indices = @transform_5, window_bounds = array<i64: 32, 32>}, {pipeline_mode = #tpu.pipeline_mode<synchronous>, transform_indices = @transform_6, window_bounds = array<i64: 1, 32>}, {pipeline_mode = #tpu.pipeline_mode<synchronous>, transform_indices = @transform_7, window_bounds = array<i64: 32, 16>}, {pipeline_mode = #tpu.pipeline_mode<synchronous>, transform_indices = @transform_8, window_bounds = array<i64: 1, 16>}, {transform_indices = @transform_9, window_bounds = array<i64: 152, 16>}]} {
    %c0 = arith.constant 0 : index
    %c0_0 = arith.constant 0 : index
    %0 = vector.load %arg1[%c0, %c0_0] : memref<152x16xf32, #tpu.memory_space<vmem>>, vector<152x16xf32>
    %c0_1 = arith.constant 0 : index
    %c0_2 = arith.constant 0 : index
    %1 = vector.load %arg2[%c0_1, %c0_2] : memref<16x32xf32, #tpu.memory_space<vmem>>, vector<16x32xf32>
    %c0_3 = arith.constant 0 : index
    %c0_4 = arith.constant 0 : index
    %2 = vector.load %arg3[%c0_3, %c0_4] : memref<1x32xf32, #tpu.memory_space<vmem>>, vector<1x32xf32>
    %cst = arith.constant dense<0.000000e+00> : vector<152x32xf32>
    %3 = tpu.matmul %0, %1, %cst {dimension_numbers = #tpu.dot_dimension_numbers<[1], [0], [0], [1], [0, 0, 1, 1], [], []>} : vector<152x16xf32>, vector<16x32xf32>, vector<152x32xf32> -> vector<152x32xf32>
    %4 = vector.broadcast %2 : vector<1x32xf32> to vector<152x32xf32>
    %5 = arith.addf %3, %4 : vector<152x32xf32>
    %cst_5 = arith.constant 0.000000e+00 : f32
    %6 = vector.broadcast %cst_5 : f32 to vector<152x32xf32>
    %7 = arith.maximumf %5, %6 : vector<152x32xf32>
    %c0_6 = arith.constant 0 : index
    %c0_7 = arith.constant 0 : index
    %8 = vector.load %arg4[%c0_6, %c0_7] : memref<32x32xf32, #tpu.memory_space<vmem>>, vector<32x32xf32>
    %c0_8 = arith.constant 0 : index
    %c0_9 = arith.constant 0 : index
    %9 = vector.load %arg5[%c0_8, %c0_9] : memref<1x32xf32, #tpu.memory_space<vmem>>, vector<1x32xf32>
    %cst_10 = arith.constant dense<0.000000e+00> : vector<152x32xf32>
    %10 = tpu.matmul %7, %8, %cst_10 {dimension_numbers = #tpu.dot_dimension_numbers<[1], [0], [0], [1], [0, 0, 1, 1], [], []>} : vector<152x32xf32>, vector<32x32xf32>, vector<152x32xf32> -> vector<152x32xf32>
    %11 = vector.broadcast %9 : vector<1x32xf32> to vector<152x32xf32>
    %12 = arith.addf %10, %11 : vector<152x32xf32>
    %cst_11 = arith.constant 0.000000e+00 : f32
    %13 = vector.broadcast %cst_11 : f32 to vector<152x32xf32>
    %14 = arith.maximumf %12, %13 : vector<152x32xf32>
    %c0_12 = arith.constant 0 : index
    %c0_13 = arith.constant 0 : index
    %15 = vector.load %arg6[%c0_12, %c0_13] : memref<32x32xf32, #tpu.memory_space<vmem>>, vector<32x32xf32>
    %c0_14 = arith.constant 0 : index
    %c0_15 = arith.constant 0 : index
    %16 = vector.load %arg7[%c0_14, %c0_15] : memref<1x32xf32, #tpu.memory_space<vmem>>, vector<1x32xf32>
    %cst_16 = arith.constant dense<0.000000e+00> : vector<152x32xf32>
    %17 = tpu.matmul %14, %15, %cst_16 {dimension_numbers = #tpu.dot_dimension_numbers<[1], [0], [0], [1], [0, 0, 1, 1], [], []>} : vector<152x32xf32>, vector<32x32xf32>, vector<152x32xf32> -> vector<152x32xf32>
    %18 = vector.broadcast %16 : vector<1x32xf32> to vector<152x32xf32>
    %19 = arith.addf %17, %18 : vector<152x32xf32>
    %cst_17 = arith.constant 0.000000e+00 : f32
    %20 = vector.broadcast %cst_17 : f32 to vector<152x32xf32>
    %21 = arith.maximumf %19, %20 : vector<152x32xf32>
    %c0_18 = arith.constant 0 : index
    %c0_19 = arith.constant 0 : index
    %22 = vector.load %arg8[%c0_18, %c0_19] : memref<32x16xf32, #tpu.memory_space<vmem>>, vector<32x16xf32>
    %c0_20 = arith.constant 0 : index
    %c0_21 = arith.constant 0 : index
    %23 = vector.load %arg9[%c0_20, %c0_21] : memref<1x16xf32, #tpu.memory_space<vmem>>, vector<1x16xf32>
    %cst_22 = arith.constant dense<0.000000e+00> : vector<152x16xf32>
    %24 = tpu.matmul %21, %22, %cst_22 {dimension_numbers = #tpu.dot_dimension_numbers<[1], [0], [0], [1], [0, 0, 1, 1], [], []>} : vector<152x32xf32>, vector<32x16xf32>, vector<152x16xf32> -> vector<152x16xf32>
    %25 = vector.broadcast %23 : vector<1x16xf32> to vector<152x16xf32>
    %26 = arith.addf %24, %25 : vector<152x16xf32>
    %c0_23 = arith.constant 0 : index
    %c0_24 = arith.constant 0 : index
    %27 = vector.load %arg10[%c0_23, %c0_24] : memref<152x16xf32, #tpu.memory_space<vmem>>, vector<152x16xf32>
    tpu.vector_store %arg10[%c0_23, %c0_24], %26 {strides = array<i32>} : memref<152x16xf32, #tpu.memory_space<vmem>>, vector<152x16xf32>,
    return
  }
  func.func @transform_0(%arg0: i32) -> (i32, i32) {
    %c0_i32 = arith.constant 0 : i32
    %c0_i32_0 = arith.constant 0 : i32
    return %arg0, %c0_i32 : i32, i32
  }
  func.func @transform_1(%arg0: i32) -> (i32, i32) {
    %c0_i32 = arith.constant 0 : i32
    %c0_i32_0 = arith.constant 0 : i32
    %c0_i32_1 = arith.constant 0 : i32
    return %c0_i32, %c0_i32_0 : i32, i32
  }
  func.func @transform_2(%arg0: i32) -> (i32, i32) {
    %c0_i32 = arith.constant 0 : i32
    %c0_i32_0 = arith.constant 0 : i32
    %c0_i32_1 = arith.constant 0 : i32
    return %c0_i32, %c0_i32_0 : i32, i32
  }
  func.func @transform_3(%arg0: i32) -> (i32, i32) {
    %c0_i32 = arith.constant 0 : i32
    %c0_i32_0 = arith.constant 0 : i32
    %c0_i32_1 = arith.constant 0 : i32
    return %c0_i32, %c0_i32_0 : i32, i32
  }
  func.func @transform_4(%arg0: i32) -> (i32, i32) {
    %c0_i32 = arith.constant 0 : i32
    %c0_i32_0 = arith.constant 0 : i32
    %c0_i32_1 = arith.constant 0 : i32
    return %c0_i32, %c0_i32_0 : i32, i32
  }
  func.func @transform_5(%arg0: i32) -> (i32, i32) {
    %c0_i32 = arith.constant 0 : i32
    %c0_i32_0 = arith.constant 0 : i32
    %c0_i32_1 = arith.constant 0 : i32
    return %c0_i32, %c0_i32_0 : i32, i32
  }
  func.func @transform_6(%arg0: i32) -> (i32, i32) {
    %c0_i32 = arith.constant 0 : i32
    %c0_i32_0 = arith.constant 0 : i32
    %c0_i32_1 = arith.constant 0 : i32
    return %c0_i32, %c0_i32_0 : i32, i32
  }
  func.func @transform_7(%arg0: i32) -> (i32, i32) {
    %c0_i32 = arith.constant 0 : i32
    %c0_i32_0 = arith.constant 0 : i32
    %c0_i32_1 = arith.constant 0 : i32
    return %c0_i32, %c0_i32_0 : i32, i32
  }
  func.func @transform_8(%arg0: i32) -> (i32, i32) {
    %c0_i32 = arith.constant 0 : i32
    %c0_i32_0 = arith.constant 0 : i32
    %c0_i32_1 = arith.constant 0 : i32
    return %c0_i32, %c0_i32_0 : i32, i32
  }
  func.func @transform_9(%arg0: i32) -> (i32, i32) {
    %c0_i32 = arith.constant 0 : i32
    %c0_i32_0 = arith.constant 0 : i32
    return %arg0, %c0_i32 : i32, i32
  }
}

</mosaic_0001>

<bundles_post_ra>
// kernel: tpu_custom_call.1
= control target key start
LH: loop header
LB: loop body
LE: loop exit
PB: predicated region body
PF: predicated region fallthrough
CT: control target
= control target key end

     0   :  { %s1904_s30 = smov 0   ;;  %s2369_s0 = inlined_call_operand.vmem [shape: f32[304,16], index: 0, kind: input, shape index: {}]   ;;  %s2370_s1 = inlined_call_operand.vmem [shape: f32[16,32], index: 1, kind: input, shape index: {}]   ;;  %s2371_s2 = inlined_call_operand.vmem [shape: f32[1,32], index: 2, kind: input, shape index: {}]   ;;  %s2372_s3 = inlined_call_operand.vmem [shape: f32[32,32], index: 3, kind: input, shape index: {}]   ;;  %s2373_s4 = inlined_call_operand.vmem [shape: f32[1,32], index: 4, kind: input, shape index: {}]   ;;  %s2374_s5 = inlined_call_operand.vmem [shape: f32[32,32], index: 5, kind: input, shape index: {}]   ;;  %s2375_s6 = inlined_call_operand.vmem [shape: f32[1,32], index: 6, kind: input, shape index: {}]   ;;  %s2376_s7 = inlined_call_operand.vmem [shape: f32[32,16], index: 7, kind: input, shape index: {}]   ;;  %s2377_s8 = inlined_call_operand.vmem [shape: f32[1,16], index: 8, kind: input, shape index: {}]   ;;  %s2378_s9 = inlined_call_operand.vmem [shape: f32[304,16], index: 9, kind: output, shape index: {}]  }
   0x1 LB: > { %s1399_s10 = sadd.s32 4294967295, %s1850_s30   ;;  %p1403_p0 = scmp.ge.s32.totalorder %s1850_s30, 1  ;;  %s1850_s30 = sphi %s1904_s30, %s19_s30  }
   0x2   : > { %p288_p1 = scmp.lt.s32.totalorder %s1850_s30, 3 }
   0x4   : > { %p289_p2 = pnand %p1403_p0, %p288_p1 }
   0x5   : > { %s324_s13 = smul.u32 (!%p289_p2), 19, %s1399_s10 }
   0x6   : > { %292 = sbr.rel (%p289_p2) target bundleno = 876 (0x36c), region = 56 }
   0x7   : > { %p325_p3 = scmp.lt.s32.totalorder (!%p289_p2), %s324_s13, 37 }
   0xb   : > { %v356_v0 = vld [vmem:[%s2370_s1 + $0x8] sm:$0xff]  ;;  %v1852_v1 = vmov 0.0   ;;  %v355_v2 = vld [vmem:[%s2370_s1] sm:$0xff]  ;;  %vm1853_vm0 = vmmov 0   ;;  %v604_v3 = vld [vmem:[%s2372_s3 + $0x18] sm:$0xff]  ;;  %s2380_s13 = smov (!%p325_p3, %s324_s13), 37 }
   0xc   : > { %1578 = vmatprep.subr.mxu0 %v1852_v1  ;;  %1582 = vmatprep.mubr.msk.f32.mxu0 %vm1853_vm0, %v1852_v1  ;;  %s1404_s18 = sshll.u32 %s2380_s13, 3  ;;  %vm364_vm1 = vcmask 130048   ;;  %v603_v21 = vld [vmem:[%s2372_s3 + $0x10] sm:$0xff]  ;;  %v602_v23 = vld [vmem:[%s2372_s3 + $0x8] sm:$0xff]  ;;  %v601_v24 = vld [vmem:[%s2372_s3] sm:$0xff]  ;;  %vm612_vm2 = vcmask 261120  }
   0xd   : > { %1579 = vmatpush3.msra.mxu0 %v356_v0  ;;  %1639 = vmatprep.subr.mxu1 %v1852_v1  ;;  %s1938_s21 = scalar_lea.vmem %s2369_s0, %s1404_s18  ;;  %v852_v26 = vld [vmem:[%s2374_s5 + $0x18] sm:$0xff]  ;;  %v851_v27 = vld [vmem:[%s2374_s5 + $0x10] sm:$0xff]  ;;  %v850_v28 = vld [vmem:[%s2374_s5 + $0x8] sm:$0xff]  ;;  %s2307_s17 = scalar_lea.vmem %s2378_s9, %s1404_s18 }
   0xe   : > { %1580 = vmatprep.subr.mxu0 %v1852_v1  ;;  %1640 = vmatpush3.msra.mxu1 %v604_v3  ;;  %v336_v4 = vld [vmem:[%s1938_s21] sm:$0xff]  ;;  %v337_v5 = vld [vmem:[%s1938_s21 + $0x8] sm:$0xff]  ;;  %v338_v6 = vld [vmem:[%s1938_s21 + $0x10] sm:$0xff] }
   0xf   : > { %1581 = vmatpush3.msra.mxu0 %v355_v2  ;;  %1641 = vmatprep.subr.mxu1 %v1852_v1  ;;  %v339_v7 = vld [vmem:[%s1938_s21 + $0x18] sm:$0xff]  ;;  %v340_v8 = vld [vmem:[%s1938_s21 + $0x20] sm:$0xff]  ;;  %v341_v9 = vld [vmem:[%s1938_s21 + $0x28] sm:$0xff] }
  0x10   : > { %1647 = vmatprep.mubr.msk.f32.mxu1 %vm1853_vm0, %v1852_v1  ;;  %1704 = vmatprep.subr.mxu0 %v1852_v1  ;;  %v342_v10 = vld [vmem:[%s1938_s21 + $0x30] sm:$0xff]  ;;  %v343_v11 = vld [vmem:[%s1938_s21 + $0x38] sm:$0xff]  ;;  %v344_v12 = vld [vmem:[%s1938_s21 + $0x40] sm:$0xff] }
  0x11   : > { %1583 = vmatmul.mubr.msk.f32.vlgmr.msra.gmra.mxu0 %vm364_vm1, %v336_v4  ;;  %v345_v13 = vld [vmem:[%s1938_s21 + $0x48] sm:$0xff]  ;;  %v346_v14 = vld [vmem:[%s1938_s21 + $0x50] sm:$0xff]  ;;  %v347_v15 = vld [vmem:[%s1938_s21 + $0x58] sm:$0xff]  ;;  %1642 = vmatpush3.msra.mxu1 %v603_v21 }
  0x12   : > { %1585 = vmatprep.mubr.msk.f32.mxu0 %vm1853_vm0, %v1852_v1  ;;  %v348_v16 = vld [vmem:[%s1938_s21 + $0x60] sm:$0xff]  ;;  %v349_v17 = vld [vmem:[%s1938_s21 + $0x68] sm:$0xff]  ;;  %v350_v18 = vld [vmem:[%s1938_s21 + $0x70] sm:$0xff]  ;;  %1643 = vmatprep.subr.mxu1 %v1852_v1 }
  0x13   : > { %v351_v19 = vld [vmem:[%s1938_s21 + $0x78] sm:$0xff]  ;;  %v352_v20 = vld [vmem:[%s1938_s21 + $0x80] sm:$0xff]  ;;  %v353_v22 = vld [vmem:[%s1938_s21 + $0x88] sm:$0xff]  ;;  %1644 = vmatpush3.msra.mxu1 %v602_v23  ;;  %1705 = vmatpush3.msra.mxu0 %v852_v26 }
  0x14   : > { %1645 = vmatprep.subr.mxu1 %v1852_v1  ;;  %v354_v25 = vld [vmem:[%s1938_s21 + $0x90] sm:$0xff]  ;;  %1706 = vmatprep.subr.mxu0 %v1852_v1  ;;  %v849_v29 = vld [vmem:[%s2374_s5] sm:$0xff] }
  0x15   : > { %1586 = vmatmul.mubr.msk.f32.gmra.mxu0 %vm364_vm1, %v337_v5  ;;  %1646 = vmatpush3.msra.mxu1 %v601_v24  ;;  %v2046_v30 = vld [vmem:[%s2371_s2] ss:$0 sm:$0xff] }
  0x16   : > { %1588 = vmatprep.mubr.msk.f32.mxu0 %vm1853_vm0, %v1852_v1  ;;  %1769 = vmatprep.subr.mxu1 %v1852_v1 }
  0x17   : > { %1707 = vmatpush3.msra.mxu0 %v851_v27 }
  0x18   : > { %1708 = vmatprep.subr.mxu0 %v1852_v1 }
  0x19   : > { %1589 = vmatmul.mubr.msk.f32.gmra.mxu0 %vm364_vm1, %v338_v6 }
  0x1a   : > { %1591 = vmatprep.mubr.msk.f32.mxu0 %vm1853_vm0, %v1852_v1  ;;  %1709 = vmatpush3.msra.mxu0 %v850_v28 }
  0x1b   : > { %1710 = vmatprep.subr.mxu0 %v1852_v1 }
  0x1c   : > { %1711 = vmatpush3.msra.mxu0 %v849_v29 }
  0x1d   : > { %1592 = vmatmul.mubr.msk.f32.gmra.mxu0 %vm364_vm1, %v339_v7 }
  0x1e   : > { %1594 = vmatprep.mubr.msk.f32.mxu0 %vm1853_vm0, %v1852_v1 }
  0x21   : > { %1595 = vmatmul.mubr.msk.f32.gmra.mxu0 %vm364_vm1, %v340_v8 }
  0x22   : > { %1597 = vmatprep.mubr.msk.f32.mxu0 %vm1853_vm0, %v1852_v1 }
  0x25   : > { %1598 = vmatmul.mubr.msk.f32.gmra.mxu0 %vm364_vm1, %v341_v9 }
  0x26   : > { %1600 = vmatprep.mubr.msk.f32.mxu0 %vm1853_vm0, %v1852_v1 }
  0x29   : > { %1601 = vmatmul.mubr.msk.f32.gmra.mxu0 %vm364_vm1, %v342_v10 }
  0x2a   : > { %1603 = vmatprep.mubr.msk.f32.mxu0 %vm1853_vm0, %v1852_v1 }
  0x2d   : > { %1604 = vmatmul.mubr.msk.f32.gmra.mxu0 %vm364_vm1, %v343_v11 }
  0x2e   : > { %1606 = vmatprep.mubr.msk.f32.mxu0 %vm1853_vm0, %v1852_v1 }
  0x31   : > { %1607 = vmatmul.mubr.msk.f32.gmra.mxu0 %vm364_vm1, %v344_v12 }
  0x32   : > { %1609 = vmatprep.mubr.msk.f32.mxu0 %vm1853_vm0, %v1852_v1 }
  0x35   : > { %1610 = vmatmul.mubr.msk.f32.gmra.mxu0 %vm364_vm1, %v345_v13 }
  0x36   : > { %1612 = vmatprep.mubr.msk.f32.mxu0 %vm1853_vm0, %v1852_v1 }
  0x39   : > { %1613 = vmatmul.mubr.msk.f32.gmra.mxu0 %vm364_vm1, %v346_v14 }
  0x3a   : > { %1615 = vmatprep.mubr.msk.f32.mxu0 %vm1853_vm0, %v1852_v1 }
  0x3d   : > { %1616 = vmatmul.mubr.msk.f32.gmra.mxu0 %vm364_vm1, %v347_v15 }
  0x3e   : > { %1618 = vmatprep.mubr.msk.f32.mxu0 %vm1853_vm0, %v1852_v1 }
  0x41   : > { %1619 = vmatmul.mubr.msk.f32.gmra.mxu0 %vm364_vm1, %v348_v16 }
  0x42   : > { %1621 = vmatprep.mubr.msk.f32.mxu0 %vm1853_vm0, %v1852_v1 }
  0x45   : > { %1622 = vmatmul.mubr.msk.f32.gmra.mxu0 %vm364_vm1, %v349_v17 }
  0x46   : > { %1624 = vmatprep.mubr.msk.f32.mxu0 %vm1853_vm0, %v1852_v1 }
  0x49   : > { %1625 = vmatmul.mubr.msk.f32.gmra.mxu0 %vm364_vm1, %v350_v18 }
  0x4a   : > { %1627 = vmatprep.mubr.msk.f32.mxu0 %vm1853_vm0, %v1852_v1 }
  0x4d   : > { %1628 = vmatmul.mubr.msk.f32.gmra.mxu0 %vm364_vm1, %v351_v19 }
  0x4e   : > { %1630 = vmatprep.mubr.msk.f32.mxu0 %vm1853_vm0, %v1852_v1 }
  0x51   : > { %1631 = vmatmul.mubr.msk.f32.gmra.mxu0 %vm364_vm1, %v352_v20 }
  0x52   : > { %1633 = vmatprep.mubr.msk.f32.mxu0 %vm1853_vm0, %v1852_v1 }
  0x55   : > { %1634 = vmatmul.mubr.msk.f32.gmra.mxu0 %vm364_vm1, %v353_v22 }
  0x56   : > { %1636 = vmatprep.mubr.msk.f32.mxu0 %vm1853_vm0, %v1852_v1 }
  0x59   : > { %1637 = vmatmul.mubr.msk.f32.gmra.mxu0 %vm364_vm1, %v354_v25 }
  0x5a   : > { %1712 = vmatprep.mubr.msk.f32.mxu0 %vm1853_vm0, %v1852_v1 }
  0xd1   : > { %v488_v31 = vpop.f32.mrf.mxu0 }
  0xd2   : > { %v489_v32 = vadd.f32 %v2046_v30, %v488_v31 }
  0xd3   : > { %v1584_v33 = vpop.f32.mrf.mxu0 }
  0xd4   : > { %v582_v34 = vmax.f32 %v489_v32, 0.0 }
  0xd5   : > { %v493_v35 = vpop.f32.mrf.mxu0 }
  0xd6   : > { %v494_v36 = vadd.f32 %v2046_v30, %v493_v35  ;;  %1648 = vmatmul.mubr.msk.f32.vlgmr.msra.gmra.mxu1 %vm612_vm2, %v582_v34 }
  0xd7   : > { %v1587_v37 = vpop.f32.mrf.mxu0  ;;  %1650 = vmatprep.mubr.msk.f32.mxu1 %vm1853_vm0, %v1852_v1 }
  0xd8   : > { %v583_v38 = vmax.f32 %v494_v36, 0.0 }
  0xd9   : > { %v498_v39 = vpop.f32.mrf.mxu0 }
  0xda   : > { %v499_v40 = vadd.f32 %v2046_v30, %v498_v39  ;;  %1651 = vmatmul.mubr.msk.f32.gmra.mxu1 %vm612_vm2, %v583_v38 }
  0xdb   : > { %v1590_v41 = vpop.f32.mrf.mxu0  ;;  %1653 = vmatprep.mubr.msk.f32.mxu1 %vm1853_vm0, %v1852_v1 }
  0xdc   : > { %v584_v42 = vmax.f32 %v499_v40, 0.0 }
  0xdd   : > { %v503_v43 = vpop.f32.mrf.mxu0 }
  0xde   : > { %v504_v44 = vadd.f32 %v2046_v30, %v503_v43  ;;  %1654 = vmatmul.mubr.msk.f32.gmra.mxu1 %vm612_vm2, %v584_v42 }
  0xdf   : > { %v1593_v45 = vpop.f32.mrf.mxu0  ;;  %1656 = vmatprep.mubr.msk.f32.mxu1 %vm1853_vm0, %v1852_v1 }
  0xe0   : > { %v585_v46 = vmax.f32 %v504_v44, 0.0  ;;  %v1099_v45 = vld [vmem:[%s2376_s7 + $0x18] sm:$0xff] }
  0xe1   : > { %v508_v47 = vpop.f32.mrf.mxu0  ;;  %1770 = vmatpush3.msra.mxu1 %v1099_v45 }
  0xe2   : > { %v509_v48 = vadd.f32 %v2046_v30, %v508_v47  ;;  %1657 = vmatmul.mubr.msk.f32.gmra.mxu1 %vm612_vm2, %v585_v46  ;;  %1771 = vmatprep.subr.mxu1 %v1852_v1  ;;  %v1097_v46 = vld [vmem:[%s2376_s7 + $0x8] sm:$0xff]  ;;  %v1096_v47 = vld [vmem:[%s2376_s7] sm:$0xff] }
  0xe3   : > { %v1596_v49 = vpop.f32.mrf.mxu0  ;;  %1659 = vmatprep.mubr.msk.f32.mxu1 %vm1853_vm0, %v1852_v1 }
  0xe4   : > { %v586_v50 = vmax.f32 %v509_v48, 0.0  ;;  %v2142_v48 = vld [vmem:[%s2373_s4] ss:$0 sm:$0xff] }
  0xe5   : > { %v513_v51 = vpop.f32.mrf.mxu0 }
  0xe6   : > { %v514_v52 = vadd.f32 %v2046_v30, %v513_v51  ;;  %1660 = vmatmul.mubr.msk.f32.gmra.mxu1 %vm612_vm2, %v586_v50 }
  0xe7   : > { %v1599_v53 = vpop.f32.mrf.mxu0  ;;  %1662 = vmatprep.mubr.msk.f32.mxu1 %vm1853_vm0, %v1852_v1 }
  0xe8   : > { %v587_v54 = vmax.f32 %v514_v52, 0.0 }
  0xe9   : > { %v518_v55 = vpop.f32.mrf.mxu0 }
  0xea   : > { %v519_v56 = vadd.f32 %v2046_v30, %v518_v55  ;;  %1663 = vmatmul.mubr.msk.f32.gmra.mxu1 %vm612_vm2, %v587_v54 }
  0xeb   : > { %v1602_v57 = vpop.f32.mrf.mxu0  ;;  %1665 = vmatprep.mubr.msk.f32.mxu1 %vm1853_vm0, %v1852_v1 }
  0xec   : > { %v588_v58 = vmax.f32 %v519_v56, 0.0 }
  0xed   : > { %v523_v59 = vpop.f32.mrf.mxu0 }
  0xee   : > { %v524_v60 = vadd.f32 %v2046_v30, %v523_v59  ;;  %1666 = vmatmul.mubr.msk.f32.gmra.mxu1 %vm612_vm2, %v588_v58 }
  0xef   : > { %v1605_v61 = vpop.f32.mrf.mxu0  ;;  %1668 = vmatprep.mubr.msk.f32.mxu1 %vm1853_vm0, %v1852_v1 }
  0xf0   : > { %v589_v62 = vmax.f32 %v524_v60, 0.0 }
  0xf1   : > { %v528_v63 = vpop.f32.mrf.mxu0 }
  0xf2   : > { %v529_v0 = vadd.f32 %v2046_v30, %v528_v63  ;;  %1669 = vmatmul.mubr.msk.f32.gmra.mxu1 %vm612_vm2, %v589_v62 }
  0xf3   : > { %v1608_v2 = vpop.f32.mrf.mxu0  ;;  %1671 = vmatprep.mubr.msk.f32.mxu1 %vm1853_vm0, %v1852_v1 }
  0xf4   : > { %v590_v3 = vmax.f32 %v529_v0, 0.0 }
  0xf5   : > { %v533_v4 = vpop.f32.mrf.mxu0 }
  0xf6   : > { %v534_v5 = vadd.f32 %v2046_v30, %v533_v4  ;;  %1672 = vmatmul.mubr.msk.f32.gmra.mxu1 %vm612_vm2, %v590_v3 }
  0xf7   : > { %v1611_v6 = vpop.f32.mrf.mxu0  ;;  %1674 = vmatprep.mubr.msk.f32.mxu1 %vm1853_vm0, %v1852_v1 }
  0xf8   : > { %v591_v7 = vmax.f32 %v534_v5, 0.0 }
  0xf9   : > { %v538_v8 = vpop.f32.mrf.mxu0 }
  0xfa   : > { %v539_v9 = vadd.f32 %v2046_v30, %v538_v8  ;;  %1675 = vmatmul.mubr.msk.f32.gmra.mxu1 %vm612_vm2, %v591_v7 }
  0xfb   : > { %v1614_v10 = vpop.f32.mrf.mxu0  ;;  %1677 = vmatprep.mubr.msk.f32.mxu1 %vm1853_vm0, %v1852_v1 }
  0xfc   : > { %v592_v11 = vmax.f32 %v539_v9, 0.0 }
  0xfd   : > { %v543_v12 = vpop.f32.mrf.mxu0 }
  0xfe   : > { %v544_v13 = vadd.f32 %v2046_v30, %v543_v12  ;;  %1678 = vmatmul.mubr.msk.f32.gmra.mxu1 %vm612_vm2, %v592_v11 }
  0xff   : > { %v1617_v14 = vpop.f32.mrf.mxu0  ;;  %1680 = vmatprep.mubr.msk.f32.mxu1 %vm1853_vm0, %v1852_v1 }
 0x100   : > { %v593_v15 = vmax.f32 %v544_v13, 0.0 }
 0x101   : > { %v548_v16 = vpop.f32.mrf.mxu0 }
 0x102   : > { %v549_v17 = vadd.f32 %v2046_v30, %v548_v16  ;;  %1681 = vmatmul.mubr.msk.f32.gmra.mxu1 %vm612_vm2, %v593_v15 }
 0x103   : > { %v1620_v18 = vpop.f32.mrf.mxu0  ;;  %1683 = vmatprep.mubr.msk.f32.mxu1 %vm1853_vm0, %v1852_v1 }
 0x104   : > { %v594_v19 = vmax.f32 %v549_v17, 0.0 }
 0x105   : > { %v553_v20 = vpop.f32.mrf.mxu0 }
 0x106   : > { %v554_v21 = vadd.f32 %v2046_v30, %v553_v20  ;;  %1684 = vmatmul.mubr.msk.f32.gmra.mxu1 %vm612_vm2, %v594_v19 }
 0x107   : > { %v1623_v22 = vpop.f32.mrf.mxu0  ;;  %1686 = vmatprep.mubr.msk.f32.mxu1 %vm1853_vm0, %v1852_v1 }
 0x108   : > { %v595_v23 = vmax.f32 %v554_v21, 0.0 }
 0x109   : > { %v558_v24 = vpop.f32.mrf.mxu0 }
 0x10a   : > { %v559_v25 = vadd.f32 %v2046_v30, %v558_v24  ;;  %1687 = vmatmul.mubr.msk.f32.gmra.mxu1 %vm612_vm2, %v595_v23 }
 0x10b   : > { %v1626_v26 = vpop.f32.mrf.mxu0  ;;  %1689 = vmatprep.mubr.msk.f32.mxu1 %vm1853_vm0, %v1852_v1 }
 0x10c   : > { %v596_v27 = vmax.f32 %v559_v25, 0.0 }
 0x10d   : > { %v563_v28 = vpop.f32.mrf.mxu0 }
 0x10e   : > { %v564_v29 = vadd.f32 %v2046_v30, %v563_v28  ;;  %1690 = vmatmul.mubr.msk.f32.gmra.mxu1 %vm612_vm2, %v596_v27 }
 0x10f   : > { %v1629_v31 = vpop.f32.mrf.mxu0  ;;  %1692 = vmatprep.mubr.msk.f32.mxu1 %vm1853_vm0, %v1852_v1 }
 0x110   : > { %v597_v32 = vmax.f32 %v564_v29, 0.0 }
 0x111   : > { %v568_v33 = vpop.f32.mrf.mxu0 }
 0x112   : > { %v569_v34 = vadd.f32 %v2046_v30, %v568_v33  ;;  %1693 = vmatmul.mubr.msk.f32.gmra.mxu1 %vm612_vm2, %v597_v32 }
 0x113   : > { %v1632_v35 = vpop.f32.mrf.mxu0  ;;  %1695 = vmatprep.mubr.msk.f32.mxu1 %vm1853_vm0, %v1852_v1 }
 0x114   : > { %v598_v36 = vmax.f32 %v569_v34, 0.0 }
 0x115   : > { %v573_v37 = vpop.f32.mrf.mxu0 }
 0x116   : > { %v574_v38 = vadd.f32 %v2046_v30, %v573_v37  ;;  %1696 = vmatmul.mubr.msk.f32.gmra.mxu1 %vm612_vm2, %v598_v36 }
 0x117   : > { %v1635_v39 = vpop.f32.mrf.mxu0  ;;  %1698 = vmatprep.mubr.msk.f32.mxu1 %vm1853_vm0, %v1852_v1 }
 0x118   : > { %v599_v40 = vmax.f32 %v574_v38, 0.0 }
 0x119   : > { %v578_v41 = vpop.f32.mrf.mxu0 }
 0x11a   : > { %v579_v42 = vadd.f32 %v2046_v30, %v578_v41  ;;  %1699 = vmatmul.mubr.msk.f32.gmra.mxu1 %vm612_vm2, %v599_v40  ;;  %v1098_v30 = vld [vmem:[%s2376_s7 + $0x10] sm:$0xff] }
 0x11b   : > { %v1638_v43 = vpop.f32.mrf.mxu0  ;;  %1701 = vmatprep.mubr.msk.f32.mxu1 %vm1853_vm0, %v1852_v1  ;;  %1772 = vmatpush3.msra.mxu1 %v1098_v30 }
 0x11c   : > { %v600_v44 = vmax.f32 %v579_v42, 0.0  ;;  %1773 = vmatprep.subr.mxu1 %v1852_v1 }
 0x11d   : > { %1774 = vmatpush3.msra.mxu1 %v1097_v46 }
 0x11e   : > { %1702 = vmatmul.mubr.msk.f32.gmra.mxu1 %vm612_vm2, %v600_v44  ;;  %1775 = vmatprep.subr.mxu1 %v1852_v1 }
 0x11f   : > { %1777 = vmatprep.mubr.msk.f32.mxu1 %vm1853_vm0, %v1852_v1  ;;  %1776 = vmatpush3.msra.mxu1 %v1096_v47 }
 0x196   : > { %v736_v49 = vpop.f32.mrf.mxu1 }
 0x197   : > { %v737_v50 = vadd.f32 %v2142_v48, %v736_v49 }
 0x198   : > { %v1649_v51 = vpop.f32.mrf.mxu1 }
 0x199   : > { %v830_v52 = vmax.f32 %v737_v50, 0.0 }
 0x19a   : > { %v741_v53 = vpop.f32.mrf.mxu1 }
 0x19b   : > { %v742_v54 = vadd.f32 %v2142_v48, %v741_v53  ;;  %1713 = vmatmul.mubr.msk.f32.vlgmr.msra.gmra.mxu0 %vm612_vm2, %v830_v52 }
 0x19c   : > { %v1652_v55 = vpop.f32.mrf.mxu1  ;;  %1715 = vmatprep.mubr.msk.f32.mxu0 %vm1853_vm0, %v1852_v1 }
 0x19d   : > { %v831_v56 = vmax.f32 %v742_v54, 0.0 }
 0x19e   : > { %v746_v57 = vpop.f32.mrf.mxu1 }
 0x19f   : > { %v747_v58 = vadd.f32 %v2142_v48, %v746_v57  ;;  %1716 = vmatmul.mubr.msk.f32.gmra.mxu0 %vm612_vm2, %v831_v56 }
 0x1a0   : > { %v1655_v59 = vpop.f32.mrf.mxu1  ;;  %1718 = vmatprep.mubr.msk.f32.mxu0 %vm1853_vm0, %v1852_v1 }
 0x1a1   : > { %v832_v60 = vmax.f32 %v747_v58, 0.0 }
 0x1a2   : > { %v751_v61 = vpop.f32.mrf.mxu1 }
 0x1a3   : > { %v752_v62 = vadd.f32 %v2142_v48, %v751_v61  ;;  %1719 = vmatmul.mubr.msk.f32.gmra.mxu0 %vm612_vm2, %v832_v60 }
 0x1a4   : > { %v1658_v63 = vpop.f32.mrf.mxu1  ;;  %1721 = vmatprep.mubr.msk.f32.mxu0 %vm1853_vm0, %v1852_v1 }
 0x1a5   : > { %v833_v0 = vmax.f32 %v752_v62, 0.0  ;;  %v2221_v63 = vld [vmem:[%s2375_s6] ss:$0 sm:$0xff] }
 0x1a6   : > { %v756_v2 = vpop.f32.mrf.mxu1 }
 0x1a7   : > { %v757_v3 = vadd.f32 %v2142_v48, %v756_v2  ;;  %1722 = vmatmul.mubr.msk.f32.gmra.mxu0 %vm612_vm2, %v833_v0 }
 0x1a8   : > { %v1661_v4 = vpop.f32.mrf.mxu1  ;;  %1724 = vmatprep.mubr.msk.f32.mxu0 %vm1853_vm0, %v1852_v1 }
 0x1a9   : > { %v834_v5 = vmax.f32 %v757_v3, 0.0 }
 0x1aa   : > { %v761_v6 = vpop.f32.mrf.mxu1 }
 0x1ab   : > { %v762_v7 = vadd.f32 %v2142_v48, %v761_v6  ;;  %1725 = vmatmul.mubr.msk.f32.gmra.mxu0 %vm612_vm2, %v834_v5 }
 0x1ac   : > { %v1664_v8 = vpop.f32.mrf.mxu1  ;;  %1727 = vmatprep.mubr.msk.f32.mxu0 %vm1853_vm0, %v1852_v1 }
 0x1ad   : > { %v835_v9 = vmax.f32 %v762_v7, 0.0 }
 0x1ae   : > { %v766_v10 = vpop.f32.mrf.mxu1 }
 0x1af   : > { %v767_v11 = vadd.f32 %v2142_v48, %v766_v10  ;;  %1728 = vmatmul.mubr.msk.f32.gmra.mxu0 %vm612_vm2, %v835_v9 }
 0x1b0   : > { %v1667_v12 = vpop.f32.mrf.mxu1  ;;  %1730 = vmatprep.mubr.msk.f32.mxu0 %vm1853_vm0, %v1852_v1 }
 0x1b1   : > { %v836_v13 = vmax.f32 %v767_v11, 0.0 }
 0x1b2   : > { %v771_v14 = vpop.f32.mrf.mxu1 }
 0x1b3   : > { %v772_v15 = vadd.f32 %v2142_v48, %v771_v14  ;;  %1731 = vmatmul.mubr.msk.f32.gmra.mxu0 %vm612_vm2, %v836_v13 }
 0x1b4   : > { %v1670_v16 = vpop.f32.mrf.mxu1  ;;  %1733 = vmatprep.mubr.msk.f32.mxu0 %vm1853_vm0, %v1852_v1 }
 0x1b5   : > { %v837_v17 = vmax.f32 %v772_v15, 0.0 }
 0x1b6   : > { %v776_v18 = vpop.f32.mrf.mxu1 }
 0x1b7   : > { %v777_v19 = vadd.f32 %v2142_v48, %v776_v18  ;;  %1734 = vmatmul.mubr.msk.f32.gmra.mxu0 %vm612_vm2, %v837_v17 }
 0x1b8   : > { %v1673_v20 = vpop.f32.mrf.mxu1  ;;  %1736 = vmatprep.mubr.msk.f32.mxu0 %vm1853_vm0, %v1852_v1 }
 0x1b9   : > { %v838_v21 = vmax.f32 %v777_v19, 0.0 }
 0x1ba   : > { %v781_v22 = vpop.f32.mrf.mxu1 }
 0x1bb   : > { %v782_v23 = vadd.f32 %v2142_v48, %v781_v22  ;;  %1737 = vmatmul.mubr.msk.f32.gmra.mxu0 %vm612_vm2, %v838_v21 }
 0x1bc   : > { %v1676_v24 = vpop.f32.mrf.mxu1  ;;  %1739 = vmatprep.mubr.msk.f32.mxu0 %vm1853_vm0, %v1852_v1 }
 0x1bd   : > { %v839_v25 = vmax.f32 %v782_v23, 0.0 }
 0x1be   : > { %v786_v26 = vpop.f32.mrf.mxu1 }
 0x1bf   : > { %v787_v27 = vadd.f32 %v2142_v48, %v786_v26  ;;  %1740 = vmatmul.mubr.msk.f32.gmra.mxu0 %vm612_vm2, %v839_v25 }
 0x1c0   : > { %v1679_v28 = vpop.f32.mrf.mxu1  ;;  %1742 = vmatprep.mubr.msk.f32.mxu0 %vm1853_vm0, %v1852_v1 }
 0x1c1   : > { %v840_v29 = vmax.f32 %v787_v27, 0.0 }
 0x1c2   : > { %v791_v31 = vpop.f32.mrf.mxu1 }
 0x1c3   : > { %v792_v32 = vadd.f32 %v2142_v48, %v791_v31  ;;  %1743 = vmatmul.mubr.msk.f32.gmra.mxu0 %vm612_vm2, %v840_v29 }
 0x1c4   : > { %v1682_v33 = vpop.f32.mrf.mxu1  ;;  %1745 = vmatprep.mubr.msk.f32.mxu0 %vm1853_vm0, %v1852_v1 }
 0x1c5   : > { %v841_v34 = vmax.f32 %v792_v32, 0.0 }
 0x1c6   : > { %v796_v35 = vpop.f32.mrf.mxu1 }
 0x1c7   : > { %v797_v36 = vadd.f32 %v2142_v48, %v796_v35  ;;  %1746 = vmatmul.mubr.msk.f32.gmra.mxu0 %vm612_vm2, %v841_v34 }
 0x1c8   : > { %v1685_v37 = vpop.f32.mrf.mxu1  ;;  %1748 = vmatprep.mubr.msk.f32.mxu0 %vm1853_vm0, %v1852_v1 }
 0x1c9   : > { %v842_v38 = vmax.f32 %v797_v36, 0.0 }
 0x1ca   : > { %v801_v39 = vpop.f32.mrf.mxu1 }
 0x1cb   : > { %v802_v40 = vadd.f32 %v2142_v48, %v801_v39  ;;  %1749 = vmatmul.mubr.msk.f32.gmra.mxu0 %vm612_vm2, %v842_v38 }
 0x1cc   : > { %v1688_v41 = vpop.f32.mrf.mxu1  ;;  %1751 = vmatprep.mubr.msk.f32.mxu0 %vm1853_vm0, %v1852_v1 }
 0x1cd   : > { %v843_v42 = vmax.f32 %v802_v40, 0.0 }
 0x1ce   : > { %v806_v43 = vpop.f32.mrf.mxu1 }
 0x1cf   : > { %v807_v44 = vadd.f32 %v2142_v48, %v806_v43  ;;  %1752 = vmatmul.mubr.msk.f32.gmra.mxu0 %vm612_vm2, %v843_v42 }
 0x1d0   : > { %v1691_v45 = vpop.f32.mrf.mxu1  ;;  %1754 = vmatprep.mubr.msk.f32.mxu0 %vm1853_vm0, %v1852_v1 }
 0x1d1   : > { %v844_v30 = vmax.f32 %v807_v44, 0.0 }
 0x1d2   : > { %v811_v46 = vpop.f32.mrf.mxu1 }
 0x1d3   : > { %v812_v47 = vadd.f32 %v2142_v48, %v811_v46  ;;  %1755 = vmatmul.mubr.msk.f32.gmra.mxu0 %vm612_vm2, %v844_v30 }
 0x1d4   : > { %v1694_v49 = vpop.f32.mrf.mxu1  ;;  %1757 = vmatprep.mubr.msk.f32.mxu0 %vm1853_vm0, %v1852_v1 }
 0x1d5   : > { %v845_v50 = vmax.f32 %v812_v47, 0.0 }
 0x1d6   : > { %v816_v51 = vpop.f32.mrf.mxu1 }
 0x1d7   : > { %v817_v52 = vadd.f32 %v2142_v48, %v816_v51  ;;  %1758 = vmatmul.mubr.msk.f32.gmra.mxu0 %vm612_vm2, %v845_v50 }
 0x1d8   : > { %v1697_v53 = vpop.f32.mrf.mxu1  ;;  %1760 = vmatprep.mubr.msk.f32.mxu0 %vm1853_vm0, %v1852_v1 }
 0x1d9   : > { %v846_v54 = vmax.f32 %v817_v52, 0.0 }
 0x1da   : > { %v821_v55 = vpop.f32.mrf.mxu1 }
 0x1db   : > { %v822_v56 = vadd.f32 %v2142_v48, %v821_v55  ;;  %1761 = vmatmul.mubr.msk.f32.gmra.mxu0 %vm612_vm2, %v846_v54 }
 0x1dc   : > { %v1700_v57 = vpop.f32.mrf.mxu1  ;;  %1763 = vmatprep.mubr.msk.f32.mxu0 %vm1853_vm0, %v1852_v1 }
 0x1dd   : > { %v847_v58 = vmax.f32 %v822_v56, 0.0 }
 0x1de   : > { %v826_v59 = vpop.f32.mrf.mxu1 }
 0x1df   : > { %v827_v60 = vadd.f32 %v2142_v48, %v826_v59  ;;  %1764 = vmatmul.mubr.msk.f32.gmra.mxu0 %vm612_vm2, %v847_v58 }
 0x1e0   : > { %v1703_v61 = vpop.f32.mrf.mxu1  ;;  %1766 = vmatprep.mubr.msk.f32.mxu0 %vm1853_vm0, %v1852_v1 }
 0x1e1   : > { %v848_v62 = vmax.f32 %v827_v60, 0.0 }
 0x1e3   : > { %1767 = vmatmul.mubr.msk.f32.gmra.mxu0 %vm612_vm2, %v848_v62 }
 0x25b   : > { %v983_v0 = vpop.f32.mrf.mxu0 }
 0x25c   : > { %v984_v2 = vadd.f32 %v2221_v63, %v983_v0 }
 0x25d   : > { %v1714_v3 = vpop.f32.mrf.mxu0 }
 0x25e   : > { %v1077_v4 = vmax.f32 %v984_v2, 0.0 }
 0x25f   : > { %v988_v48 = vpop.f32.mrf.mxu0 }
 0x260   : > { %v989_v5 = vadd.f32 %v2221_v63, %v988_v48  ;;  %1778 = vmatmul.mubr.msk.f32.vlgmr.msra.gmra.mxu1 %vm612_vm2, %v1077_v4 }
 0x261   : > { %v1717_v6 = vpop.f32.mrf.mxu0  ;;  %1780 = vmatprep.mubr.msk.f32.mxu1 %vm1853_vm0, %v1852_v1 }
 0x262   : > { %v1078_v7 = vmax.f32 %v989_v5, 0.0 }
 0x263   : > { %v993_v8 = vpop.f32.mrf.mxu0 }
 0x264   : > { %v994_v9 = vadd.f32 %v2221_v63, %v993_v8  ;;  %1781 = vmatmul.mubr.msk.f32.gmra.mxu1 %vm612_vm2, %v1078_v7 }
 0x265   : > { %v1720_v10 = vpop.f32.mrf.mxu0  ;;  %1783 = vmatprep.mubr.msk.f32.mxu1 %vm1853_vm0, %v1852_v1 }
 0x266   : > { %v1079_v11 = vmax.f32 %v994_v9, 0.0 }
 0x267   : > { %v998_v12 = vpop.f32.mrf.mxu0 }
 0x268   : > { %v999_v13 = vadd.f32 %v2221_v63, %v998_v12  ;;  %1784 = vmatmul.mubr.msk.f32.gmra.mxu1 %vm612_vm2, %v1079_v11 }
 0x269   : > { %v1723_v14 = vpop.f32.mrf.mxu0  ;;  %1786 = vmatprep.mubr.msk.f32.mxu1 %vm1853_vm0, %v1852_v1 }
 0x26a   : > { %v1080_v15 = vmax.f32 %v999_v13, 0.0  ;;  %v2300_v14 = vld [vmem:[%s2377_s8] ss:$0 sm:$0xff] }
 0x26b   : > { %v1003_v16 = vpop.f32.mrf.mxu0 }
 0x26c   : > { %v1004_v17 = vadd.f32 %v2221_v63, %v1003_v16  ;;  %1787 = vmatmul.mubr.msk.f32.gmra.mxu1 %vm612_vm2, %v1080_v15 }
 0x26d   : > { %v1726_v18 = vpop.f32.mrf.mxu0  ;;  %1789 = vmatprep.mubr.msk.f32.mxu1 %vm1853_vm0, %v1852_v1 }
 0x26e   : > { %v1081_v19 = vmax.f32 %v1004_v17, 0.0 }
 0x26f   : > { %v1008_v20 = vpop.f32.mrf.mxu0 }
 0x270   : > { %v1009_v21 = vadd.f32 %v2221_v63, %v1008_v20  ;;  %1790 = vmatmul.mubr.msk.f32.gmra.mxu1 %vm612_vm2, %v1081_v19 }
 0x271   : > { %v1729_v22 = vpop.f32.mrf.mxu0  ;;  %1792 = vmatprep.mubr.msk.f32.mxu1 %vm1853_vm0, %v1852_v1 }
 0x272   : > { %v1082_v23 = vmax.f32 %v1009_v21, 0.0 }
 0x273   : > { %v1013_v24 = vpop.f32.mrf.mxu0 }
 0x274   : > { %v1014_v25 = vadd.f32 %v2221_v63, %v1013_v24  ;;  %1793 = vmatmul.mubr.msk.f32.gmra.mxu1 %vm612_vm2, %v1082_v23 }
 0x275   : > { %v1732_v26 = vpop.f32.mrf.mxu0  ;;  %1795 = vmatprep.mubr.msk.f32.mxu1 %vm1853_vm0, %v1852_v1 }
 0x276   : > { %v1083_v27 = vmax.f32 %v1014_v25, 0.0 }
 0x277   : > { %v1018_v28 = vpop.f32.mrf.mxu0 }
 0x278   : > { %v1019_v29 = vadd.f32 %v2221_v63, %v1018_v28  ;;  %1796 = vmatmul.mubr.msk.f32.gmra.mxu1 %vm612_vm2, %v1083_v27 }
 0x279   : > { %v1735_v31 = vpop.f32.mrf.mxu0  ;;  %1798 = vmatprep.mubr.msk.f32.mxu1 %vm1853_vm0, %v1852_v1 }
 0x27a   : > { %v1084_v32 = vmax.f32 %v1019_v29, 0.0 }
 0x27b   : > { %v1023_v33 = vpop.f32.mrf.mxu0 }
 0x27c   : > { %v1024_v34 = vadd.f32 %v2221_v63, %v1023_v33  ;;  %1799 = vmatmul.mubr.msk.f32.gmra.mxu1 %vm612_vm2, %v1084_v32 }
 0x27d   : > { %v1738_v35 = vpop.f32.mrf.mxu0  ;;  %1801 = vmatprep.mubr.msk.f32.mxu1 %vm1853_vm0, %v1852_v1 }
 0x27e   : > { %v1085_v36 = vmax.f32 %v1024_v34, 0.0 }
 0x27f   : > { %v1028_v37 = vpop.f32.mrf.mxu0 }
 0x280   : > { %v1029_v38 = vadd.f32 %v2221_v63, %v1028_v37  ;;  %1802 = vmatmul.mubr.msk.f32.gmra.mxu1 %vm612_vm2, %v1085_v36 }
 0x281   : > { %v1741_v39 = vpop.f32.mrf.mxu0  ;;  %1804 = vmatprep.mubr.msk.f32.mxu1 %vm1853_vm0, %v1852_v1 }
 0x282   : > { %v1086_v40 = vmax.f32 %v1029_v38, 0.0 }
 0x283   : > { %v1033_v41 = vpop.f32.mrf.mxu0 }
 0x284   : > { %v1034_v42 = vadd.f32 %v2221_v63, %v1033_v41  ;;  %1805 = vmatmul.mubr.msk.f32.gmra.mxu1 %vm612_vm2, %v1086_v40 }
 0x285   : > { %v1744_v43 = vpop.f32.mrf.mxu0  ;;  %1807 = vmatprep.mubr.msk.f32.mxu1 %vm1853_vm0, %v1852_v1 }
 0x286   : > { %v1087_v44 = vmax.f32 %v1034_v42, 0.0 }
 0x287   : > { %v1038_v45 = vpop.f32.mrf.mxu0 }
 0x288   : > { %v1039_v30 = vadd.f32 %v2221_v63, %v1038_v45  ;;  %1808 = vmatmul.mubr.msk.f32.gmra.mxu1 %vm612_vm2, %v1087_v44 }
 0x289   : > { %v1747_v46 = vpop.f32.mrf.mxu0  ;;  %1810 = vmatprep.mubr.msk.f32.mxu1 %vm1853_vm0, %v1852_v1 }
 0x28a   : > { %v1088_v47 = vmax.f32 %v1039_v30, 0.0 }
 0x28b   : > { %v1043_v49 = vpop.f32.mrf.mxu0 }
 0x28c   : > { %v1044_v50 = vadd.f32 %v2221_v63, %v1043_v49  ;;  %1811 = vmatmul.mubr.msk.f32.gmra.mxu1 %vm612_vm2, %v1088_v47 }
 0x28d   : > { %v1750_v51 = vpop.f32.mrf.mxu0  ;;  %1813 = vmatprep.mubr.msk.f32.mxu1 %vm1853_vm0, %v1852_v1 }
 0x28e   : > { %v1089_v52 = vmax.f32 %v1044_v50, 0.0 }
 0x28f   : > { %v1048_v53 = vpop.f32.mrf.mxu0 }
 0x290   : > { %v1049_v54 = vadd.f32 %v2221_v63, %v1048_v53  ;;  %1814 = vmatmul.mubr.msk.f32.gmra.mxu1 %vm612_vm2, %v1089_v52 }
 0x291   : > { %v1753_v55 = vpop.f32.mrf.mxu0  ;;  %1816 = vmatprep.mubr.msk.f32.mxu1 %vm1853_vm0, %v1852_v1 }
 0x292   : > { %v1090_v56 = vmax.f32 %v1049_v54, 0.0 }
 0x293   : > { %v1053_v57 = vpop.f32.mrf.mxu0 }
 0x294   : > { %v1054_v58 = vadd.f32 %v2221_v63, %v1053_v57  ;;  %1817 = vmatmul.mubr.msk.f32.gmra.mxu1 %vm612_vm2, %v1090_v56 }
 0x295   : > { %v1756_v59 = vpop.f32.mrf.mxu0  ;;  %1819 = vmatprep.mubr.msk.f32.mxu1 %vm1853_vm0, %v1852_v1 }
 0x296   : > { %v1091_v60 = vmax.f32 %v1054_v58, 0.0 }
 0x297   : > { %v1058_v61 = vpop.f32.mrf.mxu0 }
 0x298   : > { %v1059_v62 = vadd.f32 %v2221_v63, %v1058_v61  ;;  %1820 = vmatmul.mubr.msk.f32.gmra.mxu1 %vm612_vm2, %v1091_v60 }
 0x299   : > { %v1759_v0 = vpop.f32.mrf.mxu0  ;;  %1822 = vmatprep.mubr.msk.f32.mxu1 %vm1853_vm0, %v1852_v1 }
 0x29a   : > { %v1092_v2 = vmax.f32 %v1059_v62, 0.0 }
 0x29b   : > { %v1063_v3 = vpop.f32.mrf.mxu0 }
 0x29c   : > { %v1064_v4 = vadd.f32 %v2221_v63, %v1063_v3  ;;  %1823 = vmatmul.mubr.msk.f32.gmra.mxu1 %vm612_vm2, %v1092_v2 }
 0x29d   : > { %v1762_v48 = vpop.f32.mrf.mxu0  ;;  %1825 = vmatprep.mubr.msk.f32.mxu1 %vm1853_vm0, %v1852_v1 }
 0x29e   : > { %v1093_v5 = vmax.f32 %v1064_v4, 0.0 }
 0x29f   : > { %v1068_v6 = vpop.f32.mrf.mxu0 }
 0x2a0   : > { %v1069_v7 = vadd.f32 %v2221_v63, %v1068_v6  ;;  %1826 = vmatmul.mubr.msk.f32.gmra.mxu1 %vm612_vm2, %v1093_v5 }
 0x2a1   : > { %v1765_v8 = vpop.f32.mrf.mxu0  ;;  %1828 = vmatprep.mubr.msk.f32.mxu1 %vm1853_vm0, %v1852_v1 }
 0x2a2   : > { %v1094_v9 = vmax.f32 %v1069_v7, 0.0 }
 0x2a3   : > { %v1073_v10 = vpop.f32.mrf.mxu0 }
 0x2a4   : > { %v1074_v11 = vadd.f32 %v2221_v63, %v1073_v10  ;;  %1829 = vmatmul.mubr.msk.f32.gmra.mxu1 %vm612_vm2, %v1094_v9 }
 0x2a5   : > { %v1768_v12 = vpop.f32.mrf.mxu0  ;;  %1831 = vmatprep.mubr.msk.f32.mxu1 %vm1853_vm0, %v1852_v1 }
 0x2a6   : > { %v1095_v13 = vmax.f32 %v1074_v11, 0.0 }
 0x2a8   : > { %1832 = vmatmul.mubr.msk.f32.gmra.mxu1 %vm612_vm2, %v1095_v13 }
 0x320   : > { %v1230_v63 = vpop.f32.mrf.mxu1 }
 0x321   : > { %v1231_v1 = vadd.f32 %v2300_v14, %v1230_v63 }
 0x322   : > { %v1779_v15 = vpop.f32.mrf.mxu1 }
 0x323   : > { %1324 = vst.msk [vmem:[%s2307_s17] sm:$0xff] %vm364_vm1, %v1231_v1 }
 0x324   : > { %v1235_v16 = vpop.f32.mrf.mxu1 }
 0x325   : > { %v1236_v17 = vadd.f32 %v2300_v14, %v1235_v16 }
 0x326   : > { %v1782_v18 = vpop.f32.mrf.mxu1 }
 0x327   : > { %1325 = vst.msk [vmem:[%s2307_s17 + $0x8] sm:$0xff] %vm364_vm1, %v1236_v17 }
 0x328   : > { %v1240_v19 = vpop.f32.mrf.mxu1 }
 0x329   : > { %v1241_v20 = vadd.f32 %v2300_v14, %v1240_v19 }
 0x32a   : > { %v1785_v21 = vpop.f32.mrf.mxu1 }
 0x32b   : > { %1326 = vst.msk [vmem:[%s2307_s17 + $0x10] sm:$0xff] %vm364_vm1, %v1241_v20 }
 0x32c   : > { %v1245_v22 = vpop.f32.mrf.mxu1 }
 0x32d   : > { %v1246_v23 = vadd.f32 %v2300_v14, %v1245_v22 }
 0x32e   : > { %v1788_v24 = vpop.f32.mrf.mxu1 }
 0x32f   : > { %1327 = vst.msk [vmem:[%s2307_s17 + $0x18] sm:$0xff] %vm364_vm1, %v1246_v23 }
 0x330   : > { %v1250_v25 = vpop.f32.mrf.mxu1 }
 0x331   : > { %v1251_v26 = vadd.f32 %v2300_v14, %v1250_v25 }
 0x332   : > { %v1791_v27 = vpop.f32.mrf.mxu1 }
 0x333   : > { %1328 = vst.msk [vmem:[%s2307_s17 + $0x20] sm:$0xff] %vm364_vm1, %v1251_v26 }
 0x334   : > { %v1255_v28 = vpop.f32.mrf.mxu1 }
 0x335   : > { %v1256_v29 = vadd.f32 %v2300_v14, %v1255_v28 }
 0x336   : > { %v1794_v31 = vpop.f32.mrf.mxu1 }
 0x337   : > { %1329 = vst.msk [vmem:[%s2307_s17 + $0x28] sm:$0xff] %vm364_vm1, %v1256_v29 }
 0x338   : > { %v1260_v32 = vpop.f32.mrf.mxu1 }
 0x339   : > { %v1261_v33 = vadd.f32 %v2300_v14, %v1260_v32 }
 0x33a   : > { %v1797_v34 = vpop.f32.mrf.mxu1 }
 0x33b   : > { %1330 = vst.msk [vmem:[%s2307_s17 + $0x30] sm:$0xff] %vm364_vm1, %v1261_v33 }
 0x33c   : > { %v1265_v35 = vpop.f32.mrf.mxu1 }
 0x33d   : > { %v1266_v36 = vadd.f32 %v2300_v14, %v1265_v35 }
 0x33e   : > { %v1800_v37 = vpop.f32.mrf.mxu1 }
 0x33f   : > { %1331 = vst.msk [vmem:[%s2307_s17 + $0x38] sm:$0xff] %vm364_vm1, %v1266_v36 }
 0x340   : > { %v1270_v38 = vpop.f32.mrf.mxu1 }
 0x341   : > { %v1271_v39 = vadd.f32 %v2300_v14, %v1270_v38 }
 0x342   : > { %v1803_v40 = vpop.f32.mrf.mxu1 }
 0x343   : > { %1332 = vst.msk [vmem:[%s2307_s17 + $0x40] sm:$0xff] %vm364_vm1, %v1271_v39 }
 0x344   : > { %v1275_v41 = vpop.f32.mrf.mxu1 }
 0x345   : > { %v1276_v42 = vadd.f32 %v2300_v14, %v1275_v41 }
 0x346   : > { %v1806_v43 = vpop.f32.mrf.mxu1 }
 0x347   : > { %1333 = vst.msk [vmem:[%s2307_s17 + $0x48] sm:$0xff] %vm364_vm1, %v1276_v42 }
 0x348   : > { %v1280_v44 = vpop.f32.mrf.mxu1 }
 0x349   : > { %v1281_v45 = vadd.f32 %v2300_v14, %v1280_v44 }
 0x34a   : > { %v1809_v30 = vpop.f32.mrf.mxu1 }
 0x34b   : > { %1334 = vst.msk [vmem:[%s2307_s17 + $0x50] sm:$0xff] %vm364_vm1, %v1281_v45 }
 0x34c   : > { %v1285_v46 = vpop.f32.mrf.mxu1 }
 0x34d   : > { %v1286_v47 = vadd.f32 %v2300_v14, %v1285_v46 }
 0x34e   : > { %v1812_v49 = vpop.f32.mrf.mxu1 }
 0x34f   : > { %1335 = vst.msk [vmem:[%s2307_s17 + $0x58] sm:$0xff] %vm364_vm1, %v1286_v47 }
 0x350   : > { %v1290_v50 = vpop.f32.mrf.mxu1 }
 0x351   : > { %v1291_v51 = vadd.f32 %v2300_v14, %v1290_v50 }
 0x352   : > { %v1815_v52 = vpop.f32.mrf.mxu1 }
 0x353   : > { %1336 = vst.msk [vmem:[%s2307_s17 + $0x60] sm:$0xff] %vm364_vm1, %v1291_v51 }
 0x354   : > { %v1295_v53 = vpop.f32.mrf.mxu1 }
 0x355   : > { %v1296_v54 = vadd.f32 %v2300_v14, %v1295_v53 }
 0x356   : > { %v1818_v55 = vpop.f32.mrf.mxu1 }
 0x357   : > { %1337 = vst.msk [vmem:[%s2307_s17 + $0x68] sm:$0xff] %vm364_vm1, %v1296_v54 }
 0x358   : > { %v1300_v56 = vpop.f32.mrf.mxu1 }
 0x359   : > { %v1301_v57 = vadd.f32 %v2300_v14, %v1300_v56 }
 0x35a   : > { %v1821_v58 = vpop.f32.mrf.mxu1 }
 0x35b   : > { %1338 = vst.msk [vmem:[%s2307_s17 + $0x70] sm:$0xff] %vm364_vm1, %v1301_v57 }
 0x35c   : > { %v1305_v59 = vpop.f32.mrf.mxu1 }
 0x35d   : > { %v1306_v60 = vadd.f32 %v2300_v14, %v1305_v59 }
 0x35e   : > { %v1824_v61 = vpop.f32.mrf.mxu1 }
 0x35f   : > { %1339 = vst.msk [vmem:[%s2307_s17 + $0x78] sm:$0xff] %vm364_vm1, %v1306_v60 }
 0x360   : > { %v1310_v62 = vpop.f32.mrf.mxu1 }
 0x361   : > { %v1311_v0 = vadd.f32 %v2300_v14, %v1310_v62 }
 0x362   : > { %v1827_v2 = vpop.f32.mrf.mxu1 }
 0x363   : > { %1340 = vst.msk [vmem:[%s2307_s17 + $0x80] sm:$0xff] %vm364_vm1, %v1311_v0 }
 0x364   : > { %v1315_v3 = vpop.f32.mrf.mxu1 }
 0x365   : > { %v1316_v4 = vadd.f32 %v2300_v14, %v1315_v3 }
 0x366   : > { %v1830_v48 = vpop.f32.mrf.mxu1 }
 0x367   : > { %1341 = vst.msk [vmem:[%s2307_s17 + $0x88] sm:$0xff] %vm364_vm1, %v1316_v4 }
 0x368   : > { %v1320_v5 = vpop.f32.mrf.mxu1 }
 0x369   : > { %v1321_v6 = vadd.f32 %v2300_v14, %v1320_v5 }
 0x36a   : > { %v1833_v7 = vpop.f32.mrf.mxu1 }
 0x36b   : > { %1342 = vst.msk [vmem:[%s2307_s17 + $0x90] sm:$0xff] %vm364_vm1, %v1321_v6 }
 0x36c PF: > { %s19_s30 = sadd.s32 1, %s1850_s30  }
 0x36d   : > { %p16_p4 = scmp.ge.s32.totalorder %s19_s30, 4  }
 0x36f   :  { %18 = sbr.rel (!%p16_p4) target bundleno = 1 (0x1), region = 86 }

// kernel: tpu_custom_call.1
= control target key start
LH: loop header
LB: loop body
LE: loop exit
PB: predicated region body
PF: predicated region fallthrough
CT: control target
= control target key end

     0   :  { %s1904_s30 = smov 0   ;;  %s2369_s0 = inlined_call_operand.vmem [shape: f32[304,16], index: 0, kind: input, shape index: {}]   ;;  %s2370_s1 = inlined_call_operand.vmem [shape: f32[16,32], index: 1, kind: input, shape index: {}]   ;;  %s2371_s2 = inlined_call_operand.vmem [shape: f32[1,32], index: 2, kind: input, shape index: {}]   ;;  %s2372_s3 = inlined_call_operand.vmem [shape: f32[32,32], index: 3, kind: input, shape index: {}]   ;;  %s2373_s4 = inlined_call_operand.vmem [shape: f32[1,32], index: 4, kind: input, shape index: {}]   ;;  %s2374_s5 = inlined_call_operand.vmem [shape: f32[32,32], index: 5, kind: input, shape index: {}]   ;;  %s2375_s6 = inlined_call_operand.vmem [shape: f32[1,32], index: 6, kind: input, shape index: {}]   ;;  %s2376_s7 = inlined_call_operand.vmem [shape: f32[32,16], index: 7, kind: input, shape index: {}]   ;;  %s2377_s8 = inlined_call_operand.vmem [shape: f32[1,16], index: 8, kind: input, shape index: {}]   ;;  %s2378_s9 = inlined_call_operand.vmem [shape: f32[304,16], index: 9, kind: output, shape index: {}]  }
   0x1 LB: > { %s1399_s10 = sadd.s32 4294967295, %s1850_s30   ;;  %p1403_p0 = scmp.ge.s32.totalorder %s1850_s30, 1  ;;  %s1850_s30 = sphi %s1904_s30, %s19_s30  }
   0x2   : > { %p288_p1 = scmp.lt.s32.totalorder %s1850_s30, 3 }
   0x4   : > { %p289_p2 = pnand %p1403_p0, %p288_p1 }
   0x5   : > { %s324_s13 = smul.u32 (!%p289_p2), 19, %s1399_s10 }
   0x6   : > { %292 = sbr.rel (%p289_p2) target bundleno = 876 (0x36c), region = 56 }
   0x7   : > { %p325_p3 = scmp.lt.s32.totalorder (!%p289_p2), %s324_s13, 37 }
   0xb   : > { %v356_v0 = vld [vmem:[%s2370_s1 + $0x8] sm:$0xff]  ;;  %v1852_v1 = vmov 0.0   ;;  %v355_v2 = vld [vmem:[%s2370_s1] sm:$0xff]  ;;  %vm1853_vm0 = vmmov 0   ;;  %v604_v3 = vld [vmem:[%s2372_s3 + $0x18] sm:$0xff]  ;;  %s2380_s13 = smov (!%p325_p3, %s324_s13), 37 }
   0xc   : > { %1578 = vmatprep.subr.mxu0 %v1852_v1  ;;  %1582 = vmatprep.mubr.msk.f32.mxu0 %vm1853_vm0, %v1852_v1  ;;  %s1404_s18 = sshll.u32 %s2380_s13, 3  ;;  %vm364_vm1 = vcmask 130048   ;;  %v603_v21 = vld [vmem:[%s2372_s3 + $0x10] sm:$0xff]  ;;  %v602_v23 = vld [vmem:[%s2372_s3 + $0x8] sm:$0xff]  ;;  %v601_v24 = vld [vmem:[%s2372_s3] sm:$0xff]  ;;  %vm612_vm2 = vcmask 261120  }
   0xd   : > { %1579 = vmatpush3.msra.mxu0 %v356_v0  ;;  %1639 = vmatprep.subr.mxu1 %v1852_v1  ;;  %s1938_s21 = scalar_lea.vmem %s2369_s0, %s1404_s18  ;;  %v852_v26 = vld [vmem:[%s2374_s5 + $0x18] sm:$0xff]  ;;  %v851_v27 = vld [vmem:[%s2374_s5 + $0x10] sm:$0xff]  ;;  %v850_v28 = vld [vmem:[%s2374_s5 + $0x8] sm:$0xff]  ;;  %s2307_s17 = scalar_lea.vmem %s2378_s9, %s1404_s18 }
   0xe   : > { %1580 = vmatprep.subr.mxu0 %v1852_v1  ;;  %1640 = vmatpush3.msra.mxu1 %v604_v3  ;;  %v336_v4 = vld [vmem:[%s1938_s21] sm:$0xff]  ;;  %v337_v5 = vld [vmem:[%s1938_s21 + $0x8] sm:$0xff]  ;;  %v338_v6 = vld [vmem:[%s1938_s21 + $0x10] sm:$0xff] }
   0xf   : > { %1581 = vmatpush3.msra.mxu0 %v355_v2  ;;  %1641 = vmatprep.subr.mxu1 %v1852_v1  ;;  %v339_v7 = vld [vmem:[%s1938_s21 + $0x18] sm:$0xff]  ;;  %v340_v8 = vld [vmem:[%s1938_s21 + $0x20] sm:$0xff]  ;;  %v341_v9 = vld [vmem:[%s1938_s21 + $0x28] sm:$0xff] }
  0x10   : > { %1647 = vmatprep.mubr.msk.f32.mxu1 %vm1853_vm0, %v1852_v1  ;;  %1704 = vmatprep.subr.mxu0 %v1852_v1  ;;  %v342_v10 = vld [vmem:[%s1938_s21 + $0x30] sm:$0xff]  ;;  %v343_v11 = vld [vmem:[%s1938_s21 + $0x38] sm:$0xff]  ;;  %v344_v12 = vld [vmem:[%s1938_s21 + $0x40] sm:$0xff] }
  0x11   : > { %1583 = vmatmul.mubr.msk.f32.vlgmr.msra.gmra.mxu0 %vm364_vm1, %v336_v4  ;;  %v345_v13 = vld [vmem:[%s1938_s21 + $0x48] sm:$0xff]  ;;  %v346_v14 = vld [vmem:[%s1938_s21 + $0x50] sm:$0xff]  ;;  %v347_v15 = vld [vmem:[%s1938_s21 + $0x58] sm:$0xff]  ;;  %1642 = vmatpush3.msra.mxu1 %v603_v21 }
  0x12   : > { %1585 = vmatprep.mubr.msk.f32.mxu0 %vm1853_vm0, %v1852_v1  ;;  %v348_v16 = vld [vmem:[%s1938_s21 + $0x60] sm:$0xff]  ;;  %v349_v17 = vld [vmem:[%s1938_s21 + $0x68] sm:$0xff]  ;;  %v350_v18 = vld [vmem:[%s1938_s21 + $0x70] sm:$0xff]  ;;  %1643 = vmatprep.subr.mxu1 %v1852_v1 }
  0x13   : > { %v351_v19 = vld [vmem:[%s1938_s21 + $0x78] sm:$0xff]  ;;  %v352_v20 = vld [vmem:[%s1938_s21 + $0x80] sm:$0xff]  ;;  %v353_v22 = vld [vmem:[%s1938_s21 + $0x88] sm:$0xff]  ;;  %1644 = vmatpush3.msra.mxu1 %v602_v23  ;;  %1705 = vmatpush3.msra.mxu0 %v852_v26 }
  0x14   : > { %1645 = vmatprep.subr.mxu1 %v1852_v1  ;;  %v354_v25 = vld [vmem:[%s1938_s21 + $0x90] sm:$0xff]  ;;  %1706 = vmatprep.subr.mxu0 %v1852_v1  ;;  %v849_v29 = vld [vmem:[%s2374_s5] sm:$0xff] }
  0x15   : > { %1586 = vmatmul.mubr.msk.f32.gmra.mxu0 %vm364_vm1, %v337_v5  ;;  %1646 = vmatpush3.msra.mxu1 %v601_v24  ;;  %v2046_v30 = vld [vmem:[%s2371_s2] ss:$0 sm:$0xff] }
  0x16   : > { %1588 = vmatprep.mubr.msk.f32.mxu0 %vm1853_vm0, %v1852_v1  ;;  %1769 = vmatprep.subr.mxu1 %v1852_v1 }
  0x17   : > { %1707 = vmatpush3.msra.mxu0 %v851_v27 }
  0x18   : > { %1708 = vmatprep.subr.mxu0 %v1852_v1 }
  0x19   : > { %1589 = vmatmul.mubr.msk.f32.gmra.mxu0 %vm364_vm1, %v338_v6 }
  0x1a   : > { %1591 = vmatprep.mubr.msk.f32.mxu0 %vm1853_vm0, %v1852_v1  ;;  %1709 = vmatpush3.msra.mxu0 %v850_v28 }
  0x1b   : > { %1710 = vmatprep.subr.mxu0 %v1852_v1 }
  0x1c   : > { %1711 = vmatpush3.msra.mxu0 %v849_v29 }
  0x1d   : > { %1592 = vmatmul.mubr.msk.f32.gmra.mxu0 %vm364_vm1, %v339_v7 }
  0x1e   : > { %1594 = vmatprep.mubr.msk.f32.mxu0 %vm1853_vm0, %v1852_v1 }
  0x21   : > { %1595 = vmatmul.mubr.msk.f32.gmra.mxu0 %vm364_vm1, %v340_v8 }
  0x22   : > { %1597 = vmatprep.mubr.msk.f32.mxu0 %vm1853_vm0, %v1852_v1 }
  0x25   : > { %1598 = vmatmul.mubr.msk.f32.gmra.mxu0 %vm364_vm1, %v341_v9 }
  0x26   : > { %1600 = vmatprep.mubr.msk.f32.mxu0 %vm1853_vm0, %v1852_v1 }
  0x29   : > { %1601 = vmatmul.mubr.msk.f32.gmra.mxu0 %vm364_vm1, %v342_v10 }
  0x2a   : > { %1603 = vmatprep.mubr.msk.f32.mxu0 %vm1853_vm0, %v1852_v1 }
  0x2d   : > { %1604 = vmatmul.mubr.msk.f32.gmra.mxu0 %vm364_vm1, %v343_v11 }
  0x2e   : > { %1606 = vmatprep.mubr.msk.f32.mxu0 %vm1853_vm0, %v1852_v1 }
  0x31   : > { %1607 = vmatmul.mubr.msk.f32.gmra.mxu0 %vm364_vm1, %v344_v12 }
  0x32   : > { %1609 = vmatprep.mubr.msk.f32.mxu0 %vm1853_vm0, %v1852_v1 }
  0x35   : > { %1610 = vmatmul.mubr.msk.f32.gmra.mxu0 %vm364_vm1, %v345_v13 }
  0x36   : > { %1612 = vmatprep.mubr.msk.f32.mxu0 %vm1853_vm0, %v1852_v1 }
  0x39   : > { %1613 = vmatmul.mubr.msk.f32.gmra.mxu0 %vm364_vm1, %v346_v14 }
  0x3a   : > { %1615 = vmatprep.mubr.msk.f32.mxu0 %vm1853_vm0, %v1852_v1 }
  0x3d   : > { %1616 = vmatmul.mubr.msk.f32.gmra.mxu0 %vm364_vm1, %v347_v15 }
  0x3e   : > { %1618 = vmatprep.mubr.msk.f32.mxu0 %vm1853_vm0, %v1852_v1 }
  0x41   : > { %1619 = vmatmul.mubr.msk.f32.gmra.mxu0 %vm364_vm1, %v348_v16 }
  0x42   : > { %1621 = vmatprep.mubr.msk.f32.mxu0 %vm1853_vm0, %v1852_v1 }
  0x45   : > { %1622 = vmatmul.mubr.msk.f32.gmra.mxu0 %vm364_vm1, %v349_v17 }
  0x46   : > { %1624 = vmatprep.mubr.msk.f32.mxu0 %vm1853_vm0, %v1852_v1 }
  0x49   : > { %1625 = vmatmul.mubr.msk.f32.gmra.mxu0 %vm364_vm1, %v350_v18 }
  0x4a   : > { %1627 = vmatprep.mubr.msk.f32.mxu0 %vm1853_vm0, %v1852_v1 }
  0x4d   : > { %1628 = vmatmul.mubr.msk.f32.gmra.mxu0 %vm364_vm1, %v351_v19 }
  0x4e   : > { %1630 = vmatprep.mubr.msk.f32.mxu0 %vm1853_vm0, %v1852_v1 }
  0x51   : > { %1631 = vmatmul.mubr.msk.f32.gmra.mxu0 %vm364_vm1, %v352_v20 }
  0x52   : > { %1633 = vmatprep.mubr.msk.f32.mxu0 %vm1853_vm0, %v1852_v1 }
  0x55   : > { %1634 = vmatmul.mubr.msk.f32.gmra.mxu0 %vm364_vm1, %v353_v22 }
  0x56   : > { %1636 = vmatprep.mubr.msk.f32.mxu0 %vm1853_vm0, %v1852_v1 }
  0x59   : > { %1637 = vmatmul.mubr.msk.f32.gmra.mxu0 %vm364_vm1, %v354_v25 }
  0x5a   : > { %1712 = vmatprep.mubr.msk.f32.mxu0 %vm1853_vm0, %v1852_v1 }
  0xd1   : > { %v488_v31 = vpop.f32.mrf.mxu0 }
  0xd2   : > { %v489_v32 = vadd.f32 %v2046_v30, %v488_v31 }
  0xd3   : > { %v1584_v33 = vpop.f32.mrf.mxu0 }
  0xd4   : > { %v582_v34 = vmax.f32 %v489_v32, 0.0 }
  0xd5   : > { %v493_v35 = vpop.f32.mrf.mxu0 }
  0xd6   : > { %v494_v36 = vadd.f32 %v2046_v30, %v493_v35  ;;  %1648 = vmatmul.mubr.msk.f32.vlgmr.msra.gmra.mxu1 %vm612_vm2, %v582_v34 }
  0xd7   : > { %v1587_v37 = vpop.f32.mrf.mxu0  ;;  %1650 = vmatprep.mubr.msk.f32.mxu1 %vm1853_vm0, %v1852_v1 }
  0xd8   : > { %v583_v38 = vmax.f32 %v494_v36, 0.0 }
  0xd9   : > { %v498_v39 = vpop.f32.mrf.mxu0 }
  0xda   : > { %v499_v40 = vadd.f32 %v2046_v30, %v498_v39  ;;  %1651 = vmatmul.mubr.msk.f32.gmra.mxu1 %vm612_vm2, %v583_v38 }
  0xdb   : > { %v1590_v41 = vpop.f32.mrf.mxu0  ;;  %1653 = vmatprep.mubr.msk.f32.mxu1 %vm1853_vm0, %v1852_v1 }
  0xdc   : > { %v584_v42 = vmax.f32 %v499_v40, 0.0 }
  0xdd   : > { %v503_v43 = vpop.f32.mrf.mxu0 }
  0xde   : > { %v504_v44 = vadd.f32 %v2046_v30, %v503_v43  ;;  %1654 = vmatmul.mubr.msk.f32.gmra.mxu1 %vm612_vm2, %v584_v42 }
  0xdf   : > { %v1593_v45 = vpop.f32.mrf.mxu0  ;;  %1656 = vmatprep.mubr.msk.f32.mxu1 %vm1853_vm0, %v1852_v1 }
  0xe0   : > { %v585_v46 = vmax.f32 %v504_v44, 0.0  ;;  %v1099_v45 = vld [vmem:[%s2376_s7 + $0x18] sm:$0xff] }
  0xe1   : > { %v508_v47 = vpop.f32.mrf.mxu0  ;;  %1770 = vmatpush3.msra.mxu1 %v1099_v45 }
  0xe2   : > { %v509_v48 = vadd.f32 %v2046_v30, %v508_v47  ;;  %1657 = vmatmul.mubr.msk.f32.gmra.mxu1 %vm612_vm2, %v585_v46  ;;  %1771 = vmatprep.subr.mxu1 %v1852_v1  ;;  %v1097_v46 = vld [vmem:[%s2376_s7 + $0x8] sm:$0xff]  ;;  %v1096_v47 = vld [vmem:[%s2376_s7] sm:$0xff] }
  0xe3   : > { %v1596_v49 = vpop.f32.mrf.mxu0  ;;  %1659 = vmatprep.mubr.msk.f32.mxu1 %vm1853_vm0, %v1852_v1 }
  0xe4   : > { %v586_v50 = vmax.f32 %v509_v48, 0.0  ;;  %v2142_v48 = vld [vmem:[%s2373_s4] ss:$0 sm:$0xff] }
  0xe5   : > { %v513_v51 = vpop.f32.mrf.mxu0 }
  0xe6   : > { %v514_v52 = vadd.f32 %v2046_v30, %v513_v51  ;;  %1660 = vmatmul.mubr.msk.f32.gmra.mxu1 %vm612_vm2, %v586_v50 }
  0xe7   : > { %v1599_v53 = vpop.f32.mrf.mxu0  ;;  %1662 = vmatprep.mubr.msk.f32.mxu1 %vm1853_vm0, %v1852_v1 }
  0xe8   : > { %v587_v54 = vmax.f32 %v514_v52, 0.0 }
  0xe9   : > { %v518_v55 = vpop.f32.mrf.mxu0 }
  0xea   : > { %v519_v56 = vadd.f32 %v2046_v30, %v518_v55  ;;  %1663 = vmatmul.mubr.msk.f32.gmra.mxu1 %vm612_vm2, %v587_v54 }
  0xeb   : > { %v1602_v57 = vpop.f32.mrf.mxu0  ;;  %1665 = vmatprep.mubr.msk.f32.mxu1 %vm1853_vm0, %v1852_v1 }
  0xec   : > { %v588_v58 = vmax.f32 %v519_v56, 0.0 }
  0xed   : > { %v523_v59 = vpop.f32.mrf.mxu0 }
  0xee   : > { %v524_v60 = vadd.f32 %v2046_v30, %v523_v59  ;;  %1666 = vmatmul.mubr.msk.f32.gmra.mxu1 %vm612_vm2, %v588_v58 }
  0xef   : > { %v1605_v61 = vpop.f32.mrf.mxu0  ;;  %1668 = vmatprep.mubr.msk.f32.mxu1 %vm1853_vm0, %v1852_v1 }
  0xf0   : > { %v589_v62 = vmax.f32 %v524_v60, 0.0 }
  0xf1   : > { %v528_v63 = vpop.f32.mrf.mxu0 }
  0xf2   : > { %v529_v0 = vadd.f32 %v2046_v30, %v528_v63  ;;  %1669 = vmatmul.mubr.msk.f32.gmra.mxu1 %vm612_vm2, %v589_v62 }
  0xf3   : > { %v1608_v2 = vpop.f32.mrf.mxu0  ;;  %1671 = vmatprep.mubr.msk.f32.mxu1 %vm1853_vm0, %v1852_v1 }
  0xf4   : > { %v590_v3 = vmax.f32 %v529_v0, 0.0 }
  0xf5   : > { %v533_v4 = vpop.f32.mrf.mxu0 }
  0xf6   : > { %v534_v5 = vadd.f32 %v2046_v30, %v533_v4  ;;  %1672 = vmatmul.mubr.msk.f32.gmra.mxu1 %vm612_vm2, %v590_v3 }
  0xf7   : > { %v1611_v6 = vpop.f32.mrf.mxu0  ;;  %1674 = vmatprep.mubr.msk.f32.mxu1 %vm1853_vm0, %v1852_v1 }
  0xf8   : > { %v591_v7 = vmax.f32 %v534_v5, 0.0 }
  0xf9   : > { %v538_v8 = vpop.f32.mrf.mxu0 }
  0xfa   : > { %v539_v9 = vadd.f32 %v2046_v30, %v538_v8  ;;  %1675 = vmatmul.mubr.msk.f32.gmra.mxu1 %vm612_vm2, %v591_v7 }
  0xfb   : > { %v1614_v10 = vpop.f32.mrf.mxu0  ;;  %1677 = vmatprep.mubr.msk.f32.mxu1 %vm1853_vm0, %v1852_v1 }
  0xfc   : > { %v592_v11 = vmax.f32 %v539_v9, 0.0 }
  0xfd   : > { %v543_v12 = vpop.f32.mrf.mxu0 }
  0xfe   : > { %v544_v13 = vadd.f32 %v2046_v30, %v543_v12  ;;  %1678 = vmatmul.mubr.msk.f32.gmra.mxu1 %vm612_vm2, %v592_v11 }
  0xff   : > { %v1617_v14 = vpop.f32.mrf.mxu0  ;;  %1680 = vmatprep.mubr.msk.f32.mxu1 %vm1853_vm0, %v1852_v1 }
 0x100   : > { %v593_v15 = vmax.f32 %v544_v13, 0.0 }
 0x101   : > { %v548_v16 = vpop.f32.mrf.mxu0 }
 0x102   : > { %v549_v17 = vadd.f32 %v2046_v30, %v548_v16  ;;  %1681 = vmatmul.mubr.msk.f32.gmra.mxu1 %vm612_vm2, %v593_v15 }
 0x103   : > { %v1620_v18 = vpop.f32.mrf.mxu0  ;;  %1683 = vmatprep.mubr.msk.f32.mxu1 %vm1853_vm0, %v1852_v1 }
 0x104   : > { %v594_v19 = vmax.f32 %v549_v17, 0.0 }
 0x105   : > { %v553_v20 = vpop.f32.mrf.mxu0 }
 0x106   : > { %v554_v21 = vadd.f32 %v2046_v30, %v553_v20  ;;  %1684 = vmatmul.mubr.msk.f32.gmra.mxu1 %vm612_vm2, %v594_v19 }
 0x107   : > { %v1623_v22 = vpop.f32.mrf.mxu0  ;;  %1686 = vmatprep.mubr.msk.f32.mxu1 %vm1853_vm0, %v1852_v1 }
 0x108   : > { %v595_v23 = vmax.f32 %v554_v21, 0.0 }
 0x109   : > { %v558_v24 = vpop.f32.mrf.mxu0 }
 0x10a   : > { %v559_v25 = vadd.f32 %v2046_v30, %v558_v24  ;;  %1687 = vmatmul.mubr.msk.f32.gmra.mxu1 %vm612_vm2, %v595_v23 }
 0x10b   : > { %v1626_v26 = vpop.f32.mrf.mxu0  ;;  %1689 = vmatprep.mubr.msk.f32.mxu1 %vm1853_vm0, %v1852_v1 }
 0x10c   : > { %v596_v27 = vmax.f32 %v559_v25, 0.0 }
 0x10d   : > { %v563_v28 = vpop.f32.mrf.mxu0 }
 0x10e   : > { %v564_v29 = vadd.f32 %v2046_v30, %v563_v28  ;;  %1690 = vmatmul.mubr.msk.f32.gmra.mxu1 %vm612_vm2, %v596_v27 }
 0x10f   : > { %v1629_v31 = vpop.f32.mrf.mxu0  ;;  %1692 = vmatprep.mubr.msk.f32.mxu1 %vm1853_vm0, %v1852_v1 }
 0x110   : > { %v597_v32 = vmax.f32 %v564_v29, 0.0 }
 0x111   : > { %v568_v33 = vpop.f32.mrf.mxu0 }
 0x112   : > { %v569_v34 = vadd.f32 %v2046_v30, %v568_v33  ;;  %1693 = vmatmul.mubr.msk.f32.gmra.mxu1 %vm612_vm2, %v597_v32 }
 0x113   : > { %v1632_v35 = vpop.f32.mrf.mxu0  ;;  %1695 = vmatprep.mubr.msk.f32.mxu1 %vm1853_vm0, %v1852_v1 }
 0x114   : > { %v598_v36 = vmax.f32 %v569_v34, 0.0 }
 0x115   : > { %v573_v37 = vpop.f32.mrf.mxu0 }
 0x116   : > { %v574_v38 = vadd.f32 %v2046_v30, %v573_v37  ;;  %1696 = vmatmul.mubr.msk.f32.gmra.mxu1 %vm612_vm2, %v598_v36 }
 0x117   : > { %v1635_v39 = vpop.f32.mrf.mxu0  ;;  %1698 = vmatprep.mubr.msk.f32.mxu1 %vm1853_vm0, %v1852_v1 }
 0x118   : > { %v599_v40 = vmax.f32 %v574_v38, 0.0 }
 0x119   : > { %v578_v41 = vpop.f32.mrf.mxu0 }
 0x11a   : > { %v579_v42 = vadd.f32 %v2046_v30, %v578_v41  ;;  %1699 = vmatmul.mubr.msk.f32.gmra.mxu1 %vm612_vm2, %v599_v40  ;;  %v1098_v30 = vld [vmem:[%s2376_s7 + $0x10] sm:$0xff] }
 0x11b   : > { %v1638_v43 = vpop.f32.mrf.mxu0  ;;  %1701 = vmatprep.mubr.msk.f32.mxu1 %vm1853_vm0, %v1852_v1  ;;  %1772 = vmatpush3.msra.mxu1 %v1098_v30 }
 0x11c   : > { %v600_v44 = vmax.f32 %v579_v42, 0.0  ;;  %1773 = vmatprep.subr.mxu1 %v1852_v1 }
 0x11d   : > { %1774 = vmatpush3.msra.mxu1 %v1097_v46 }
 0x11e   : > { %1702 = vmatmul.mubr.msk.f32.gmra.mxu1 %vm612_vm2, %v600_v44  ;;  %1775 = vmatprep.subr.mxu1 %v1852_v1 }
 0x11f   : > { %1777 = vmatprep.mubr.msk.f32.mxu1 %vm1853_vm0, %v1852_v1  ;;  %1776 = vmatpush3.msra.mxu1 %v1096_v47 }
 0x196   : > { %v736_v49 = vpop.f32.mrf.mxu1 }
 0x197   : > { %v737_v50 = vadd.f32 %v2142_v48, %v736_v49 }
 0x198   : > { %v1649_v51 = vpop.f32.mrf.mxu1 }
 0x199   : > { %v830_v52 = vmax.f32 %v737_v50, 0.0 }
 0x19a   : > { %v741_v53 = vpop.f32.mrf.mxu1 }
 0x19b   : > { %v742_v54 = vadd.f32 %v2142_v48, %v741_v53  ;;  %1713 = vmatmul.mubr.msk.f32.vlgmr.msra.gmra.mxu0 %vm612_vm2, %v830_v52 }
 0x19c   : > { %v1652_v55 = vpop.f32.mrf.mxu1  ;;  %1715 = vmatprep.mubr.msk.f32.mxu0 %vm1853_vm0, %v1852_v1 }
 0x19d   : > { %v831_v56 = vmax.f32 %v742_v54, 0.0 }
 0x19e   : > { %v746_v57 = vpop.f32.mrf.mxu1 }
 0x19f   : > { %v747_v58 = vadd.f32 %v2142_v48, %v746_v57  ;;  %1716 = vmatmul.mubr.msk.f32.gmra.mxu0 %vm612_vm2, %v831_v56 }
 0x1a0   : > { %v1655_v59 = vpop.f32.mrf.mxu1  ;;  %1718 = vmatprep.mubr.msk.f32.mxu0 %vm1853_vm0, %v1852_v1 }
 0x1a1   : > { %v832_v60 = vmax.f32 %v747_v58, 0.0 }
 0x1a2   : > { %v751_v61 = vpop.f32.mrf.mxu1 }
 0x1a3   : > { %v752_v62 = vadd.f32 %v2142_v48, %v751_v61  ;;  %1719 = vmatmul.mubr.msk.f32.gmra.mxu0 %vm612_vm2, %v832_v60 }
 0x1a4   : > { %v1658_v63 = vpop.f32.mrf.mxu1  ;;  %1721 = vmatprep.mubr.msk.f32.mxu0 %vm1853_vm0, %v1852_v1 }
 0x1a5   : > { %v833_v0 = vmax.f32 %v752_v62, 0.0  ;;  %v2221_v63 = vld [vmem:[%s2375_s6] ss:$0 sm:$0xff] }
 0x1a6   : > { %v756_v2 = vpop.f32.mrf.mxu1 }
 0x1a7   : > { %v757_v3 = vadd.f32 %v2142_v48, %v756_v2  ;;  %1722 = vmatmul.mubr.msk.f32.gmra.mxu0 %vm612_vm2, %v833_v0 }
 0x1a8   : > { %v1661_v4 = vpop.f32.mrf.mxu1  ;;  %1724 = vmatprep.mubr.msk.f32.mxu0 %vm1853_vm0, %v1852_v1 }
 0x1a9   : > { %v834_v5 = vmax.f32 %v757_v3, 0.0 }
 0x1aa   : > { %v761_v6 = vpop.f32.mrf.mxu1 }
 0x1ab   : > { %v762_v7 = vadd.f32 %v2142_v48, %v761_v6  ;;  %1725 = vmatmul.mubr.msk.f32.gmra.mxu0 %vm612_vm2, %v834_v5 }
 0x1ac   : > { %v1664_v8 = vpop.f32.mrf.mxu1  ;;  %1727 = vmatprep.mubr.msk.f32.mxu0 %vm1853_vm0, %v1852_v1 }
 0x1ad   : > { %v835_v9 = vmax.f32 %v762_v7, 0.0 }
 0x1ae   : > { %v766_v10 = vpop.f32.mrf.mxu1 }
 0x1af   : > { %v767_v11 = vadd.f32 %v2142_v48, %v766_v10  ;;  %1728 = vmatmul.mubr.msk.f32.gmra.mxu0 %vm612_vm2, %v835_v9 }
 0x1b0   : > { %v1667_v12 = vpop.f32.mrf.mxu1  ;;  %1730 = vmatprep.mubr.msk.f32.mxu0 %vm1853_vm0, %v1852_v1 }
 0x1b1   : > { %v836_v13 = vmax.f32 %v767_v11, 0.0 }
 0x1b2   : > { %v771_v14 = vpop.f32.mrf.mxu1 }
 0x1b3   : > { %v772_v15 = vadd.f32 %v2142_v48, %v771_v14  ;;  %1731 = vmatmul.mubr.msk.f32.gmra.mxu0 %vm612_vm2, %v836_v13 }
 0x1b4   : > { %v1670_v16 = vpop.f32.mrf.mxu1  ;;  %1733 = vmatprep.mubr.msk.f32.mxu0 %vm1853_vm0, %v1852_v1 }
 0x1b5   : > { %v837_v17 = vmax.f32 %v772_v15, 0.0 }
 0x1b6   : > { %v776_v18 = vpop.f32.mrf.mxu1 }
 0x1b7   : > { %v777_v19 = vadd.f32 %v2142_v48, %v776_v18  ;;  %1734 = vmatmul.mubr.msk.f32.gmra.mxu0 %vm612_vm2, %v837_v17 }
 0x1b8   : > { %v1673_v20 = vpop.f32.mrf.mxu1  ;;  %1736 = vmatprep.mubr.msk.f32.mxu0 %vm1853_vm0, %v1852_v1 }
 0x1b9   : > { %v838_v21 = vmax.f32 %v777_v19, 0.0 }
 0x1ba   : > { %v781_v22 = vpop.f32.mrf.mxu1 }
 0x1bb   : > { %v782_v23 = vadd.f32 %v2142_v48, %v781_v22  ;;  %1737 = vmatmul.mubr.msk.f32.gmra.mxu0 %vm612_vm2, %v838_v21 }
 0x1bc   : > { %v1676_v24 = vpop.f32.mrf.mxu1  ;;  %1739 = vmatprep.mubr.msk.f32.mxu0 %vm1853_vm0, %v1852_v1 }
 0x1bd   : > { %v839_v25 = vmax.f32 %v782_v23, 0.0 }
 0x1be   : > { %v786_v26 = vpop.f32.mrf.mxu1 }
 0x1bf   : > { %v787_v27 = vadd.f32 %v2142_v48, %v786_v26  ;;  %1740 = vmatmul.mubr.msk.f32.gmra.mxu0 %vm612_vm2, %v839_v25 }
 0x1c0   : > { %v1679_v28 = vpop.f32.mrf.mxu1  ;;  %1742 = vmatprep.mubr.msk.f32.mxu0 %vm1853_vm0, %v1852_v1 }
 0x1c1   : > { %v840_v29 = vmax.f32 %v787_v27, 0.0 }
 0x1c2   : > { %v791_v31 = vpop.f32.mrf.mxu1 }
 0x1c3   : > { %v792_v32 = vadd.f32 %v2142_v48, %v791_v31  ;;  %1743 = vmatmul.mubr.msk.f32.gmra.mxu0 %vm612_vm2, %v840_v29 }
 0x1c4   : > { %v1682_v33 = vpop.f32.mrf.mxu1  ;;  %1745 = vmatprep.mubr.msk.f32.mxu0 %vm1853_vm0, %v1852_v1 }
 0x1c5   : > { %v841_v34 = vmax.f32 %v792_v32, 0.0 }
 0x1c6   : > { %v796_v35 = vpop.f32.mrf.mxu1 }
 0x1c7   : > { %v797_v36 = vadd.f32 %v2142_v48, %v796_v35  ;;  %1746 = vmatmul.mubr.msk.f32.gmra.mxu0 %vm612_vm2, %v841_v34 }
 0x1c8   : > { %v1685_v37 = vpop.f32.mrf.mxu1  ;;  %1748 = vmatprep.mubr.msk.f32.mxu0 %vm1853_vm0, %v1852_v1 }
 0x1c9   : > { %v842_v38 = vmax.f32 %v797_v36, 0.0 }
 0x1ca   : > { %v801_v39 = vpop.f32.mrf.mxu1 }
 0x1cb   : > { %v802_v40 = vadd.f32 %v2142_v48, %v801_v39  ;;  %1749 = vmatmul.mubr.msk.f32.gmra.mxu0 %vm612_vm2, %v842_v38 }
 0x1cc   : > { %v1688_v41 = vpop.f32.mrf.mxu1  ;;  %1751 = vmatprep.mubr.msk.f32.mxu0 %vm1853_vm0, %v1852_v1 }
 0x1cd   : > { %v843_v42 = vmax.f32 %v802_v40, 0.0 }
 0x1ce   : > { %v806_v43 = vpop.f32.mrf.mxu1 }
 0x1cf   : > { %v807_v44 = vadd.f32 %v2142_v48, %v806_v43  ;;  %1752 = vmatmul.mubr.msk.f32.gmra.mxu0 %vm612_vm2, %v843_v42 }
 0x1d0   : > { %v1691_v45 = vpop.f32.mrf.mxu1  ;;  %1754 = vmatprep.mubr.msk.f32.mxu0 %vm1853_vm0, %v1852_v1 }
 0x1d1   : > { %v844_v30 = vmax.f32 %v807_v44, 0.0 }
 0x1d2   : > { %v811_v46 = vpop.f32.mrf.mxu1 }
 0x1d3   : > { %v812_v47 = vadd.f32 %v2142_v48, %v811_v46  ;;  %1755 = vmatmul.mubr.msk.f32.gmra.mxu0 %vm612_vm2, %v844_v30 }
 0x1d4   : > { %v1694_v49 = vpop.f32.mrf.mxu1  ;;  %1757 = vmatprep.mubr.msk.f32.mxu0 %vm1853_vm0, %v1852_v1 }
 0x1d5   : > { %v845_v50 = vmax.f32 %v812_v47, 0.0 }
 0x1d6   : > { %v816_v51 = vpop.f32.mrf.mxu1 }
 0x1d7   : > { %v817_v52 = vadd.f32 %v2142_v48, %v816_v51  ;;  %1758 = vmatmul.mubr.msk.f32.gmra.mxu0 %vm612_vm2, %v845_v50 }
 0x1d8   : > { %v1697_v53 = vpop.f32.mrf.mxu1  ;;  %1760 = vmatprep.mubr.msk.f32.mxu0 %vm1853_vm0, %v1852_v1 }
 0x1d9   : > { %v846_v54 = vmax.f32 %v817_v52, 0.0 }
 0x1da   : > { %v821_v55 = vpop.f32.mrf.mxu1 }
 0x1db   : > { %v822_v56 = vadd.f32 %v2142_v48, %v821_v55  ;;  %1761 = vmatmul.mubr.msk.f32.gmra.mxu0 %vm612_vm2, %v846_v54 }
 0x1dc   : > { %v1700_v57 = vpop.f32.mrf.mxu1  ;;  %1763 = vmatprep.mubr.msk.f32.mxu0 %vm1853_vm0, %v1852_v1 }
 0x1dd   : > { %v847_v58 = vmax.f32 %v822_v56, 0.0 }
 0x1de   : > { %v826_v59 = vpop.f32.mrf.mxu1 }
 0x1df   : > { %v827_v60 = vadd.f32 %v2142_v48, %v826_v59  ;;  %1764 = vmatmul.mubr.msk.f32.gmra.mxu0 %vm612_vm2, %v847_v58 }
 0x1e0   : > { %v1703_v61 = vpop.f32.mrf.mxu1  ;;  %1766 = vmatprep.mubr.msk.f32.mxu0 %vm1853_vm0, %v1852_v1 }
 0x1e1   : > { %v848_v62 = vmax.f32 %v827_v60, 0.0 }
 0x1e3   : > { %1767 = vmatmul.mubr.msk.f32.gmra.mxu0 %vm612_vm2, %v848_v62 }
 0x25b   : > { %v983_v0 = vpop.f32.mrf.mxu0 }
 0x25c   : > { %v984_v2 = vadd.f32 %v2221_v63, %v983_v0 }
 0x25d   : > { %v1714_v3 = vpop.f32.mrf.mxu0 }
 0x25e   : > { %v1077_v4 = vmax.f32 %v984_v2, 0.0 }
 0x25f   : > { %v988_v48 = vpop.f32.mrf.mxu0 }
 0x260   : > { %v989_v5 = vadd.f32 %v2221_v63, %v988_v48  ;;  %1778 = vmatmul.mubr.msk.f32.vlgmr.msra.gmra.mxu1 %vm612_vm2, %v1077_v4 }
 0x261   : > { %v1717_v6 = vpop.f32.mrf.mxu0  ;;  %1780 = vmatprep.mubr.msk.f32.mxu1 %vm1853_vm0, %v1852_v1 }
 0x262   : > { %v1078_v7 = vmax.f32 %v989_v5, 0.0 }
 0x263   : > { %v993_v8 = vpop.f32.mrf.mxu0 }
 0x264   : > { %v994_v9 = vadd.f32 %v2221_v63, %v993_v8  ;;  %1781 = vmatmul.mubr.msk.f32.gmra.mxu1 %vm612_vm2, %v1078_v7 }
 0x265   : > { %v1720_v10 = vpop.f32.mrf.mxu0  ;;  %1783 = vmatprep.mubr.msk.f32.mxu1 %vm1853_vm0, %v1852_v1 }
 0x266   : > { %v1079_v11 = vmax.f32 %v994_v9, 0.0 }
 0x267   : > { %v998_v12 = vpop.f32.mrf.mxu0 }
 0x268   : > { %v999_v13 = vadd.f32 %v2221_v63, %v998_v12  ;;  %1784 = vmatmul.mubr.msk.f32.gmra.mxu1 %vm612_vm2, %v1079_v11 }
 0x269   : > { %v1723_v14 = vpop.f32.mrf.mxu0  ;;  %1786 = vmatprep.mubr.msk.f32.mxu1 %vm1853_vm0, %v1852_v1 }
 0x26a   : > { %v1080_v15 = vmax.f32 %v999_v13, 0.0  ;;  %v2300_v14 = vld [vmem:[%s2377_s8] ss:$0 sm:$0xff] }
 0x26b   : > { %v1003_v16 = vpop.f32.mrf.mxu0 }
 0x26c   : > { %v1004_v17 = vadd.f32 %v2221_v63, %v1003_v16  ;;  %1787 = vmatmul.mubr.msk.f32.gmra.mxu1 %vm612_vm2, %v1080_v15 }
 0x26d   : > { %v1726_v18 = vpop.f32.mrf.mxu0  ;;  %1789 = vmatprep.mubr.msk.f32.mxu1 %vm1853_vm0, %v1852_v1 }
 0x26e   : > { %v1081_v19 = vmax.f32 %v1004_v17, 0.0 }
 0x26f   : > { %v1008_v20 = vpop.f32.mrf.mxu0 }
 0x270   : > { %v1009_v21 = vadd.f32 %v2221_v63, %v1008_v20  ;;  %1790 = vmatmul.mubr.msk.f32.gmra.mxu1 %vm612_vm2, %v1081_v19 }
 0x271   : > { %v1729_v22 = vpop.f32.mrf.mxu0  ;;  %1792 = vmatprep.mubr.msk.f32.mxu1 %vm1853_vm0, %v1852_v1 }
 0x272   : > { %v1082_v23 = vmax.f32 %v1009_v21, 0.0 }
 0x273   : > { %v1013_v24 = vpop.f32.mrf.mxu0 }
 0x274   : > { %v1014_v25 = vadd.f32 %v2221_v63, %v1013_v24  ;;  %1793 = vmatmul.mubr.msk.f32.gmra.mxu1 %vm612_vm2, %v1082_v23 }
 0x275   : > { %v1732_v26 = vpop.f32.mrf.mxu0  ;;  %1795 = vmatprep.mubr.msk.f32.mxu1 %vm1853_vm0, %v1852_v1 }
 0x276   : > { %v1083_v27 = vmax.f32 %v1014_v25, 0.0 }
 0x277   : > { %v1018_v28 = vpop.f32.mrf.mxu0 }
 0x278   : > { %v1019_v29 = vadd.f32 %v2221_v63, %v1018_v28  ;;  %1796 = vmatmul.mubr.msk.f32.gmra.mxu1 %vm612_vm2, %v1083_v27 }
 0x279   : > { %v1735_v31 = vpop.f32.mrf.mxu0  ;;  %1798 = vmatprep.mubr.msk.f32.mxu1 %vm1853_vm0, %v1852_v1 }
 0x27a   : > { %v1084_v32 = vmax.f32 %v1019_v29, 0.0 }
 0x27b   : > { %v1023_v33 = vpop.f32.mrf.mxu0 }
 0x27c   : > { %v1024_v34 = vadd.f32 %v2221_v63, %v1023_v33  ;;  %1799 = vmatmul.mubr.msk.f32.gmra.mxu1 %vm612_vm2, %v1084_v32 }
 0x27d   : > { %v1738_v35 = vpop.f32.mrf.mxu0  ;;  %1801 = vmatprep.mubr.msk.f32.mxu1 %vm1853_vm0, %v1852_v1 }
 0x27e   : > { %v1085_v36 = vmax.f32 %v1024_v34, 0.0 }
 0x27f   : > { %v1028_v37 = vpop.f32.mrf.mxu0 }
 0x280   : > { %v1029_v38 = vadd.f32 %v2221_v63, %v1028_v37  ;;  %1802 = vmatmul.mubr.msk.f32.gmra.mxu1 %vm612_vm2, %v1085_v36 }
 0x281   : > { %v1741_v39 = vpop.f32.mrf.mxu0  ;;  %1804 = vmatprep.mubr.msk.f32.mxu1 %vm1853_vm0, %v1852_v1 }
 0x282   : > { %v1086_v40 = vmax.f32 %v1029_v38, 0.0 }
 0x283   : > { %v1033_v41 = vpop.f32.mrf.mxu0 }
 0x284   : > { %v1034_v42 = vadd.f32 %v2221_v63, %v1033_v41  ;;  %1805 = vmatmul.mubr.msk.f32.gmra.mxu1 %vm612_vm2, %v1086_v40 }
 0x285   : > { %v1744_v43 = vpop.f32.mrf.mxu0  ;;  %1807 = vmatprep.mubr.msk.f32.mxu1 %vm1853_vm0, %v1852_v1 }
 0x286   : > { %v1087_v44 = vmax.f32 %v1034_v42, 0.0 }
 0x287   : > { %v1038_v45 = vpop.f32.mrf.mxu0 }
 0x288   : > { %v1039_v30 = vadd.f32 %v2221_v63, %v1038_v45  ;;  %1808 = vmatmul.mubr.msk.f32.gmra.mxu1 %vm612_vm2, %v1087_v44 }
 0x289   : > { %v1747_v46 = vpop.f32.mrf.mxu0  ;;  %1810 = vmatprep.mubr.msk.f32.mxu1 %vm1853_vm0, %v1852_v1 }
 0x28a   : > { %v1088_v47 = vmax.f32 %v1039_v30, 0.0 }
 0x28b   : > { %v1043_v49 = vpop.f32.mrf.mxu0 }
 0x28c   : > { %v1044_v50 = vadd.f32 %v2221_v63, %v1043_v49  ;;  %1811 = vmatmul.mubr.msk.f32.gmra.mxu1 %vm612_vm2, %v1088_v47 }
 0x28d   : > { %v1750_v51 = vpop.f32.mrf.mxu0  ;;  %1813 = vmatprep.mubr.msk.f32.mxu1 %vm1853_vm0, %v1852_v1 }
 0x28e   : > { %v1089_v52 = vmax.f32 %v1044_v50, 0.0 }
 0x28f   : > { %v1048_v53 = vpop.f32.mrf.mxu0 }
 0x290   : > { %v1049_v54 = vadd.f32 %v2221_v63, %v1048_v53  ;;  %1814 = vmatmul.mubr.msk.f32.gmra.mxu1 %vm612_vm2, %v1089_v52 }
 0x291   : > { %v1753_v55 = vpop.f32.mrf.mxu0  ;;  %1816 = vmatprep.mubr.msk.f32.mxu1 %vm1853_vm0, %v1852_v1 }
 0x292   : > { %v1090_v56 = vmax.f32 %v1049_v54, 0.0 }
 0x293   : > { %v1053_v57 = vpop.f32.mrf.mxu0 }
 0x294   : > { %v1054_v58 = vadd.f32 %v2221_v63, %v1053_v57  ;;  %1817 = vmatmul.mubr.msk.f32.gmra.mxu1 %vm612_vm2, %v1090_v56 }
 0x295   : > { %v1756_v59 = vpop.f32.mrf.mxu0  ;;  %1819 = vmatprep.mubr.msk.f32.mxu1 %vm1853_vm0, %v1852_v1 }
 0x296   : > { %v1091_v60 = vmax.f32 %v1054_v58, 0.0 }
 0x297   : > { %v1058_v61 = vpop.f32.mrf.mxu0 }
 0x298   : > { %v1059_v62 = vadd.f32 %v2221_v63, %v1058_v61  ;;  %1820 = vmatmul.mubr.msk.f32.gmra.mxu1 %vm612_vm2, %v1091_v60 }
 0x299   : > { %v1759_v0 = vpop.f32.mrf.mxu0  ;;  %1822 = vmatprep.mubr.msk.f32.mxu1 %vm1853_vm0, %v1852_v1 }
 0x29a   : > { %v1092_v2 = vmax.f32 %v1059_v62, 0.0 }
 0x29b   : > { %v1063_v3 = vpop.f32.mrf.mxu0 }
 0x29c   : > { %v1064_v4 = vadd.f32 %v2221_v63, %v1063_v3  ;;  %1823 = vmatmul.mubr.msk.f32.gmra.mxu1 %vm612_vm2, %v1092_v2 }
 0x29d   : > { %v1762_v48 = vpop.f32.mrf.mxu0  ;;  %1825 = vmatprep.mubr.msk.f32.mxu1 %vm1853_vm0, %v1852_v1 }
 0x29e   : > { %v1093_v5 = vmax.f32 %v1064_v4, 0.0 }
 0x29f   : > { %v1068_v6 = vpop.f32.mrf.mxu0 }
 0x2a0   : > { %v1069_v7 = vadd.f32 %v2221_v63, %v1068_v6  ;;  %1826 = vmatmul.mubr.msk.f32.gmra.mxu1 %vm612_vm2, %v1093_v5 }
 0x2a1   : > { %v1765_v8 = vpop.f32.mrf.mxu0  ;;  %1828 = vmatprep.mubr.msk.f32.mxu1 %vm1853_vm0, %v1852_v1 }
 0x2a2   : > { %v1094_v9 = vmax.f32 %v1069_v7, 0.0 }
 0x2a3   : > { %v1073_v10 = vpop.f32.mrf.mxu0 }
 0x2a4   : > { %v1074_v11 = vadd.f32 %v2221_v63, %v1073_v10  ;;  %1829 = vmatmul.mubr.msk.f32.gmra.mxu1 %vm612_vm2, %v1094_v9 }
 0x2a5   : > { %v1768_v12 = vpop.f32.mrf.mxu0  ;;  %1831 = vmatprep.mubr.msk.f32.mxu1 %vm1853_vm0, %v1852_v1 }
 0x2a6   : > { %v1095_v13 = vmax.f32 %v1074_v11, 0.0 }
 0x2a8   : > { %1832 = vmatmul.mubr.msk.f32.gmra.mxu1 %vm612_vm2, %v1095_v13 }
 0x320   : > { %v1230_v63 = vpop.f32.mrf.mxu1 }
 0x321   : > { %v1231_v1 = vadd.f32 %v2300_v14, %v1230_v63 }
 0x322   : > { %v1779_v15 = vpop.f32.mrf.mxu1 }
 0x323   : > { %1324 = vst.msk [vmem:[%s2307_s17] sm:$0xff] %vm364_vm1, %v1231_v1 }
 0x324   : > { %v1235_v16 = vpop.f32.mrf.mxu1 }
 0x325   : > { %v1236_v17 = vadd.f32 %v2300_v14, %v1235_v16 }
 0x326   : > { %v1782_v18 = vpop.f32.mrf.mxu1 }
 0x327   : > { %1325 = vst.msk [vmem:[%s2307_s17 + $0x8] sm:$0xff] %vm364_vm1, %v1236_v17 }
 0x328   : > { %v1240_v19 = vpop.f32.mrf.mxu1 }
 0x329   : > { %v1241_v20 = vadd.f32 %v2300_v14, %v1240_v19 }
 0x32a   : > { %v1785_v21 = vpop.f32.mrf.mxu1 }
 0x32b   : > { %1326 = vst.msk [vmem:[%s2307_s17 + $0x10] sm:$0xff] %vm364_vm1, %v1241_v20 }
 0x32c   : > { %v1245_v22 = vpop.f32.mrf.mxu1 }
 0x32d   : > { %v1246_v23 = vadd.f32 %v2300_v14, %v1245_v22 }
 0x32e   : > { %v1788_v24 = vpop.f32.mrf.mxu1 }
 0x32f   : > { %1327 = vst.msk [vmem:[%s2307_s17 + $0x18] sm:$0xff] %vm364_vm1, %v1246_v23 }
 0x330   : > { %v1250_v25 = vpop.f32.mrf.mxu1 }
 0x331   : > { %v1251_v26 = vadd.f32 %v2300_v14, %v1250_v25 }
 0x332   : > { %v1791_v27 = vpop.f32.mrf.mxu1 }
 0x333   : > { %1328 = vst.msk [vmem:[%s2307_s17 + $0x20] sm:$0xff] %vm364_vm1, %v1251_v26 }
 0x334   : > { %v1255_v28 = vpop.f32.mrf.mxu1 }
 0x335   : > { %v1256_v29 = vadd.f32 %v2300_v14, %v1255_v28 }
 0x336   : > { %v1794_v31 = vpop.f32.mrf.mxu1 }
 0x337   : > { %1329 = vst.msk [vmem:[%s2307_s17 + $0x28] sm:$0xff] %vm364_vm1, %v1256_v29 }
 0x338   : > { %v1260_v32 = vpop.f32.mrf.mxu1 }
 0x339   : > { %v1261_v33 = vadd.f32 %v2300_v14, %v1260_v32 }
 0x33a   : > { %v1797_v34 = vpop.f32.mrf.mxu1 }
 0x33b   : > { %1330 = vst.msk [vmem:[%s2307_s17 + $0x30] sm:$0xff] %vm364_vm1, %v1261_v33 }
 0x33c   : > { %v1265_v35 = vpop.f32.mrf.mxu1 }
 0x33d   : > { %v1266_v36 = vadd.f32 %v2300_v14, %v1265_v35 }
 0x33e   : > { %v1800_v37 = vpop.f32.mrf.mxu1 }
 0x33f   : > { %1331 = vst.msk [vmem:[%s2307_s17 + $0x38] sm:$0xff] %vm364_vm1, %v1266_v36 }
 0x340   : > { %v1270_v38 = vpop.f32.mrf.mxu1 }
 0x341   : > { %v1271_v39 = vadd.f32 %v2300_v14, %v1270_v38 }
 0x342   : > { %v1803_v40 = vpop.f32.mrf.mxu1 }
 0x343   : > { %1332 = vst.msk [vmem:[%s2307_s17 + $0x40] sm:$0xff] %vm364_vm1, %v1271_v39 }
 0x344   : > { %v1275_v41 = vpop.f32.mrf.mxu1 }
 0x345   : > { %v1276_v42 = vadd.f32 %v2300_v14, %v1275_v41 }
 0x346   : > { %v1806_v43 = vpop.f32.mrf.mxu1 }
 0x347   : > { %1333 = vst.msk [vmem:[%s2307_s17 + $0x48] sm:$0xff] %vm364_vm1, %v1276_v42 }
 0x348   : > { %v1280_v44 = vpop.f32.mrf.mxu1 }
 0x349   : > { %v1281_v45 = vadd.f32 %v2300_v14, %v1280_v44 }
 0x34a   : > { %v1809_v30 = vpop.f32.mrf.mxu1 }
 0x34b   : > { %1334 = vst.msk [vmem:[%s2307_s17 + $0x50] sm:$0xff] %vm364_vm1, %v1281_v45 }
 0x34c   : > { %v1285_v46 = vpop.f32.mrf.mxu1 }
 0x34d   : > { %v1286_v47 = vadd.f32 %v2300_v14, %v1285_v46 }
 0x34e   : > { %v1812_v49 = vpop.f32.mrf.mxu1 }
 0x34f   : > { %1335 = vst.msk [vmem:[%s2307_s17 + $0x58] sm:$0xff] %vm364_vm1, %v1286_v47 }
 0x350   : > { %v1290_v50 = vpop.f32.mrf.mxu1 }
 0x351   : > { %v1291_v51 = vadd.f32 %v2300_v14, %v1290_v50 }
 0x352   : > { %v1815_v52 = vpop.f32.mrf.mxu1 }
 0x353   : > { %1336 = vst.msk [vmem:[%s2307_s17 + $0x60] sm:$0xff] %vm364_vm1, %v1291_v51 }
 0x354   : > { %v1295_v53 = vpop.f32.mrf.mxu1 }
 0x355   : > { %v1296_v54 = vadd.f32 %v2300_v14, %v1295_v53 }
 0x356   : > { %v1818_v55 = vpop.f32.mrf.mxu1 }
 0x357   : > { %1337 = vst.msk [vmem:[%s2307_s17 + $0x68] sm:$0xff] %vm364_vm1, %v1296_v54 }
 0x358   : > { %v1300_v56 = vpop.f32.mrf.mxu1 }
 0x359   : > { %v1301_v57 = vadd.f32 %v2300_v14, %v1300_v56 }
 0x35a   : > { %v1821_v58 = vpop.f32.mrf.mxu1 }
 0x35b   : > { %1338 = vst.msk [vmem:[%s2307_s17 + $0x70] sm:$0xff] %vm364_vm1, %v1301_v57 }
 0x35c   : > { %v1305_v59 = vpop.f32.mrf.mxu1 }
 0x35d   : > { %v1306_v60 = vadd.f32 %v2300_v14, %v1305_v59 }
 0x35e   : > { %v1824_v61 = vpop.f32.mrf.mxu1 }
 0x35f   : > { %1339 = vst.msk [vmem:[%s2307_s17 + $0x78] sm:$0xff] %vm364_vm1, %v1306_v60 }
 0x360   : > { %v1310_v62 = vpop.f32.mrf.mxu1 }
 0x361   : > { %v1311_v0 = vadd.f32 %v2300_v14, %v1310_v62 }
 0x362   : > { %v1827_v2 = vpop.f32.mrf.mxu1 }
 0x363   : > { %1340 = vst.msk [vmem:[%s2307_s17 + $0x80] sm:$0xff] %vm364_vm1, %v1311_v0 }
 0x364   : > { %v1315_v3 = vpop.f32.mrf.mxu1 }
 0x365   : > { %v1316_v4 = vadd.f32 %v2300_v14, %v1315_v3 }
 0x366   : > { %v1830_v48 = vpop.f32.mrf.mxu1 }
 0x367   : > { %1341 = vst.msk [vmem:[%s2307_s17 + $0x88] sm:$0xff] %vm364_vm1, %v1316_v4 }
 0x368   : > { %v1320_v5 = vpop.f32.mrf.mxu1 }
 0x369   : > { %v1321_v6 = vadd.f32 %v2300_v14, %v1320_v5 }
 0x36a   : > { %v1833_v7 = vpop.f32.mrf.mxu1 }
 0x36b   : > { %1342 = vst.msk [vmem:[%s2307_s17 + $0x90] sm:$0xff] %vm364_vm1, %v1321_v6 }
 0x36c PF: > { %s19_s30 = sadd.s32 1, %s1850_s30  }
 0x36d   : > { %p16_p4 = scmp.ge.s32.totalorder %s19_s30, 4  }
 0x36f   :  { %18 = sbr.rel (!%p16_p4) target bundleno = 1 (0x1), region = 86 }

</bundles_post_ra>
